<compile_context>
chip_gen: v7x
topology: tpu7x:2x2x1
jax: 0.10.0
libtpu: 0.0.40
codegen_flags: <defaults>
</compile_context>

<pallas_src>
import functools

import jax
import jax.numpy as jnp
from jax.experimental import pallas as pl
from jax.experimental.pallas import tpu as pltpu

LANE = 128          # TPU lane width; all feature/class dims are zero-padded to this
FEAT = 32           # encoder feature width
NUM_CLASSES = 10
PRED_HIDDEN = 16


# ----------------------------------------------------------------------------
# Kernel 1: fused shared encoder
#   3x3 conv (in-VMEM im2col + single MXU matmul) + bias + ReLU + global avg pool
#   One grid step == one image of the combined [x ; view1 ; view2] batch.
# ----------------------------------------------------------------------------
def _encoder_kernel(x_ref, w_ref, b_ref, o_ref, patch_ref, *, H, W, C):
    # x_ref:     (1, H+2, W+2, C)  zero-padded NHWC slab of one image
    # w_ref:     (LANE, LANE)      im2col conv weight (rows >= 9C and cols >= F are 0)
    # b_ref:     (1, LANE)         bias (zero-padded)
    # o_ref:     (1, 1, LANE)      pooled features of this image
    # patch_ref: (H*W, LANE)       VMEM scratch: im2col patch matrix (K padded to 128)
    patch_ref[...] = jnp.zeros((H * W, LANE), jnp.float32)
    for t in range(9):
        dy, dx = divmod(t, 3)
        tap = x_ref[0, dy:dy + H, dx:dx + W, :]            # (H, W, C) shifted window
        patch_ref[:, t * C:(t + 1) * C] = tap.reshape(H * W, C)
    y = jnp.dot(patch_ref[...], w_ref[...], preferred_element_type=jnp.float32)
    y = jnp.maximum(y + b_ref[...], 0.0)                   # bias + ReLU
    o_ref[0] = jnp.sum(y, axis=0, keepdims=True) * (1.0 / (H * W))


def encoder_forward(params, views_nchw):
    """views_nchw: [Bt, C, H, W] -> pooled features [Bt, LANE] (cols >= FEAT are 0)."""
    Bt, C, H, W = views_nchw.shape
    assert 9 * C <= LANE, "im2col contraction must fit in one 128-lane tile"
    x_nhwc = jnp.transpose(views_nchw, (0, 2, 3, 1)).astype(jnp.float32)
    xpad = jnp.pad(x_nhwc, ((0, 0), (1, 1), (1, 1), (0, 0)))
    kernel = functools.partial(_encoder_kernel, H=H, W=W, C=C)
    feats = pl.pallas_call(
        kernel,
        out_shape=jax.ShapeDtypeStruct((Bt, 1, LANE), jnp.float32),
        grid=(Bt,),
        in_specs=[
            pl.BlockSpec((1, H + 2, W + 2, C), lambda b: (b, 0, 0, 0)),
            pl.BlockSpec((LANE, LANE), lambda b: (0, 0)),       # resident weights
            pl.BlockSpec((1, LANE), lambda b: (0, 0)),          # resident bias
        ],
        out_specs=pl.BlockSpec((1, 1, LANE), lambda b: (b, 0, 0)),
        scratch_shapes=[pltpu.VMEM((H * W, LANE), jnp.float32)],
        compiler_params=pltpu.CompilerParams(
            dimension_semantics=("parallel",)),
    )(xpad, params["enc_w"], params["enc_b"])
    return feats.reshape(Bt, LANE)


# ----------------------------------------------------------------------------
# Kernel 2: fused heads (net_decoder + SimSiam projector + predictor)
#   All weights resident in VMEM; intermediates never leave VMEM; lane-dense
#   (128-wide) outputs, real rows/columns sliced in the wrapper.
# ----------------------------------------------------------------------------
def _heads_kernel(feat_ref, dec_w, dec_b, pj1_w, pj1_b, pj2_w, pj2_b,
                  pr1_w, pr1_b, pr2_w, pr2_b, net_ref, z_ref, p_ref):
    f = feat_ref[...]                                       # [3B, LANE]

    def lin(v, w_r, b_r, relu=False):
        y = jnp.dot(v, w_r[...], preferred_element_type=jnp.float32) + b_r[...]
        return jnp.maximum(y, 0.0) if relu else y

    net_ref[...] = lin(f, dec_w, dec_b)                                  # decoder
    z = lin(lin(f, pj1_w, pj1_b, relu=True), pj2_w, pj2_b)               # projector
    z_ref[...] = z
    p_ref[...] = lin(lin(z, pr1_w, pr1_b, relu=True), pr2_w, pr2_b)      # predictor


def _full_spec(shape):
    n = len(shape)
    return pl.BlockSpec(shape, lambda *_: (0,) * n)


def heads_forward(params, feats):
    Bt = feats.shape[0]
    args = [feats,
            params["dec_w"], params["dec_b"],
            params["proj_w1"], params["proj_b1"],
            params["proj_w2"], params["proj_b2"],
            params["pred_w1"], params["pred_b1"],
            params["pred_w2"], params["pred_b2"]]
    out_sds = jax.ShapeDtypeStruct((Bt, LANE), jnp.float32)
    net_all, z_all, p_all = pl.pallas_call(
        _heads_kernel,
        out_shape=(out_sds, out_sds, out_sds),
        grid=(1,),
        in_specs=[_full_spec(a.shape) for a in args],
        out_specs=(_full_spec((Bt, LANE)),) * 3,
    )(*args)
    return net_all, z_all, p_all


# ----------------------------------------------------------------------------
# Kernel 3: mixup  lamda*x + (1-lamda)*buffer_x  (lamda passed through SMEM).
# Only invoked when its result is actually consumed.
# ----------------------------------------------------------------------------
def _mixup_kernel(lam_ref, x_ref, buf_ref, o_ref):
    lam = lam_ref[0, 0]
    o_ref[...] = lam * x_ref[...] + (1.0 - lam) * buf_ref[...]


def pallas_mixup(x2d, buf2d, lamda):
    B, D = x2d.shape
    lam_arr = jnp.asarray(lamda, dtype=jnp.float32).reshape(1, 1)
    return pl.pallas_call(
        _mixup_kernel,
        out_shape=jax.ShapeDtypeStruct((B, D), jnp.float32),
        grid=(1,),
        in_specs=[
            pl.BlockSpec(memory_space=pltpu.MemorySpace.SMEM),
            pl.BlockSpec((B, D), lambda i: (0, 0)),
            pl.BlockSpec((B, D), lambda i: (0, 0)),
        ],
        out_specs=pl.BlockSpec((B, D), lambda i: (0, 0)),
    )(lam_arr, x2d.astype(jnp.float32), buf2d.astype(jnp.float32))


# ----------------------------------------------------------------------------
# Forward pass mirroring ContinualModel.forward -> (net_out, p1, p2, z1, z2)
# ----------------------------------------------------------------------------
def continual_model_forward(params, x, aug1=None, aug2=None, lamda=None,
                            buffer_x=None):
    B = x.shape[0]
    # In the SimSiam_ST stand-in, orginal_mixup is only consumed when an aug view
    # is missing, so the mixup kernel is skipped when its result would be dead.
    need_mixup = (buffer_x is not None) and (aug1 is None or aug2 is None)
    if buffer_x is None:
        orginal_mixup = x
    elif need_mixup:
        if buffer_x.shape[0] != B:
            buffer_x = buffer_x[:B]
        orginal_mixup = pallas_mixup(
            x.reshape(B, -1), buffer_x.reshape(B, -1), lamda).reshape(x.shape)
    else:
        orginal_mixup = None          # dead in the fully-augmented path (perf)

    v1 = aug1 if aug1 is not None else orginal_mixup
    v2 = aug2 if aug2 is not None else orginal_mixup

    # Single fused encoder pass over all three views (weights DMA'd once).
    # The decoder branch encodes `x`, exactly as in the torch code.
    views = jnp.concatenate([x, v1, v2], axis=0)          # [3B, C, H, W]
    feats = encoder_forward(params, views)                # [3B, LANE]

    # Single fused heads pass (decoder + projector + predictor).
    net_all, z_all, p_all = heads_forward(params, feats)
    net_out = net_all[:B, :NUM_CLASSES]
    z1 = z_all[B:2 * B, :FEAT]
    z2 = z_all[2 * B:, :FEAT]
    p1 = p_all[B:2 * B, :FEAT]
    p2 = p_all[2 * B:, :FEAT]
    return net_out, p1, p2, z1, z2


# ----------------------------------------------------------------------------
# Deterministic, lane-padded parameter initialization
# ----------------------------------------------------------------------------
def init_params(key, c_in=4, feat=FEAT, num_classes=NUM_CLASSES,
                pred_hidden=PRED_HIDDEN, scale=0.2):
    assert max(feat, num_classes, pred_hidden) <= LANE and 9 * c_in <= LANE
    ks = jax.random.split(key, 12)

    def nrm(k, shape):
        return (scale * jax.random.normal(k, shape)).astype(jnp.float32)

    def pad_mat(w):
        return jnp.zeros((LANE, LANE), jnp.float32).at[:w.shape[0], :w.shape[1]].set(w)

    def pad_vec(b):
        return jnp.zeros((1, LANE), jnp.float32).at[0, :b.shape[0]].set(b)

    # conv weight in torch layout (F, C, kH, kW) -> im2col layout [(ky,kx,c), f]
    w_conv = nrm(ks[0], (feat, c_in, 3, 3))
    w_im2col = jnp.transpose(w_conv, (2, 3, 1, 0)).reshape(9 * c_in, feat)

    return {
        "enc_w": pad_mat(w_im2col),
        "enc_b": pad_vec(nrm(ks[1], (feat,))),
        "dec_w": pad_mat(nrm(ks[2], (feat, num_classes))),
        "dec_b": pad_vec(nrm(ks[3], (num_classes,))),
        "proj_w1": pad_mat(nrm(ks[4], (feat, feat))),
        "proj_b1": pad_vec(nrm(ks[5], (feat,))),
        "proj_w2": pad_mat(nrm(ks[6], (feat, feat))),
        "proj_b2": pad_vec(nrm(ks[7], (feat,))),
        "pred_w1": pad_mat(nrm(ks[8], (feat, pred_hidden))),
        "pred_b1": pad_vec(nrm(ks[9], (pred_hidden,))),
        "pred_w2": pad_mat(nrm(ks[10], (pred_hidden, feat))),
        "pred_b2": pad_vec(nrm(ks[11], (feat,))),
    }


# ----------------------------------------------------------------------------
# Pure-JAX reference (independent of the Pallas kernels) for correctness checks
# ----------------------------------------------------------------------------
def _ref_encoder(params, v, feat=FEAT):
    B, C, H, W = v.shape
    w = params["enc_w"][:9 * C, :feat].reshape(3, 3, C, feat)     # HWIO
    b = params["enc_b"][0, :feat]
    y = jax.lax.conv_general_dilated(
        v.astype(jnp.float32), w, window_strides=(1, 1), padding="SAME",
        dimension_numbers=("NCHW", "HWIO", "NHWC"))
    return jnp.maximum(y + b, 0.0).mean(axis=(1, 2))


def _ref_heads(params, fx, f1, f2):
    def lin(v, w, b, relu=False):
        y = v @ w + b
        return jnp.maximum(y, 0.0) if relu else y

    F, NC, PH = FEAT, NUM_CLASSES, PRED_HIDDEN
    net = lin(fx, params["dec_w"][:F, :NC], params["dec_b"][0, :NC])

    def proj(f):
        h = lin(f, params["proj_w1"][:F, :F], params["proj_b1"][0, :F], True)
        return lin(h, params["proj_w2"][:F, :F], params["proj_b2"][0, :F])

    def pred(z):
        h = lin(z, params["pred_w1"][:F, :PH], params["pred_b1"][0, :PH], True)
        return lin(h, params["pred_w2"][:PH, :F], params["pred_b2"][0, :F])

    z1, z2 = proj(f1), proj(f2)
    return net, pred(z1), pred(z2), z1, z2


def reference_forward(params, x, aug1=None, aug2=None, lamda=None, buffer_x=None):
    B = x.shape[0]
    if buffer_x is None:
        mix = x
    else:
        bx = buffer_x[:B] if buffer_x.shape[0] != B else buffer_x
        mix = lamda * x + (1.0 - lamda) * bx
    v1 = aug1 if aug1 is not None else mix
    v2 = aug2 if aug2 is not None else mix
    fx = _ref_encoder(params, x)
    f1 = _ref_encoder(params, v1)
    f2 = _ref_encoder(params, v2)
    return _ref_heads(params, fx, f1, f2)


# ----------------------------------------------------------------------------
if __name__ == "__main__":
    key = jax.random.PRNGKey(0)
    k_x, k_a1, k_a2, k_buf, k_p = jax.random.split(key, 5)

    B, C, H, W = 2, 4, 16, 16
    x = jax.random.normal(k_x, (B, C, H, W), dtype=jnp.float32)
    aug1 = jax.random.normal(k_a1, (B, C, H, W), dtype=jnp.float32)
    aug2 = jax.random.normal(k_a2, (B, C, H, W), dtype=jnp.float32)
    # buffer has a larger batch to exercise the truncation branch
    buffer_x = jax.random.normal(k_buf, (B + 2, C, H, W), dtype=jnp.float32)
    lamda = 0.7

    params = init_params(k_p, c_in=C)

    # Path 1: augmented views given (dead mixup is skipped).
    net_out, p1, p2, z1, z2 = continual_model_forward(
        params, x, aug1=aug1, aug2=aug2, lamda=lamda, buffer_x=buffer_x)
    jax.block_until_ready((net_out, p1, p2, z1, z2))
    assert net_out.shape == (B, NUM_CLASSES)
    assert p1.shape == (B, FEAT) and p2.shape == (B, FEAT)
    assert z1.shape == (B, FEAT) and z2.shape == (B, FEAT)

    ref = reference_forward(params, x, aug1, aug2, lamda, buffer_x)
    for name, got, want in zip(("net_out", "p1", "p2", "z1", "z2"),
                               (net_out, p1, p2, z1, z2), ref):
        assert jnp.allclose(got, want, rtol=3e-2, atol=3e-3), (
            name, float(jnp.max(jnp.abs(got - want))))

    # Path 2: no augmented views -> the Pallas mixup feeds both SimSiam views.
    outs2 = continual_model_forward(params, x, lamda=lamda, buffer_x=buffer_x)
    jax.block_until_ready(outs2)
    ref2 = reference_forward(params, x, None, None, lamda, buffer_x)
    for name, got, want in zip(("net_out", "p1", "p2", "z1", "z2"), outs2, ref2):
        assert jnp.allclose(got, want, rtol=3e-2, atol=3e-3), (
            name, float(jnp.max(jnp.abs(got - want))))

    print("KERNEL_OK")
</pallas_src>

<mosaic_0001>
module attributes {stable_mosaic.version = 11 : i64} {
  func.func @_encoder_kernel(%arg0: i32, %arg1: memref<1x18x18x4xf32, #tpu.memory_space<vmem>>, %arg2: memref<128x128xf32, #tpu.memory_space<vmem>>, %arg3: memref<1x128xf32, #tpu.memory_space<vmem>>, %arg4: memref<1x1x128xf32, #tpu.memory_space<vmem>>, %arg5: memref<256x128xf32, #tpu.memory_space<vmem>>) attributes {dimension_semantics = [#tpu.dimension_semantics<parallel>], iteration_bounds = array<i64: 6>, scalar_prefetch = 0 : i64, scratch_operands = 1 : i64, tpu.core_type = #tpu.core_type<tc>, window_params = [{transform_indices = @transform_0, window_bounds = array<i64: 1, 18, 18, 4>}, {pipeline_mode = #tpu.pipeline_mode<synchronous>, transform_indices = @transform_1, window_bounds = array<i64: 128, 128>}, {pipeline_mode = #tpu.pipeline_mode<synchronous>, transform_indices = @transform_2, window_bounds = array<i64: 1, 128>}, {transform_indices = @transform_3, window_bounds = array<i64: 1, 1, 128>}]} {
    %cst = arith.constant 0.000000e+00 : f32
    %0 = vector.broadcast %cst : f32 to vector<256x128xf32>
    %c0 = arith.constant 0 : index
    %c0_0 = arith.constant 0 : index
    %1 = vector.load %arg5[%c0, %c0_0] : memref<256x128xf32, #tpu.memory_space<vmem>>, vector<256x128xf32>
    tpu.vector_store %arg5[%c0, %c0_0], %0 {strides = array<i32>} : memref<256x128xf32, #tpu.memory_space<vmem>>, vector<256x128xf32>,
    %c0_1 = arith.constant 0 : index
    %c0_2 = arith.constant 0 : index
    %c0_3 = arith.constant 0 : index
    %c0_4 = arith.constant 0 : index
    %2 = vector.load %arg1[%c0_1, %c0_2, %c0_3, %c0_4] : memref<1x18x18x4xf32, #tpu.memory_space<vmem>>, vector<1x16x16x4xf32>
    %3 = vector.shape_cast %2 : vector<1x16x16x4xf32> to vector<16x16x4xf32>
    %4 = vector.shape_cast %3 : vector<16x16x4xf32> to vector<256x4xf32>
    %c0_5 = arith.constant 0 : index
    %c0_6 = arith.constant 0 : index
    %5 = vector.load %arg5[%c0_5, %c0_6] : memref<256x128xf32, #tpu.memory_space<vmem>>, vector<256x4xf32>
    tpu.vector_store %arg5[%c0_5, %c0_6], %4 {strides = array<i32>} : memref<256x128xf32, #tpu.memory_space<vmem>>, vector<256x4xf32>,
    %c0_7 = arith.constant 0 : index
    %c0_8 = arith.constant 0 : index
    %c1 = arith.constant 1 : index
    %c0_9 = arith.constant 0 : index
    %6 = vector.load %arg1[%c0_7, %c0_8, %c1, %c0_9] : memref<1x18x18x4xf32, #tpu.memory_space<vmem>>, vector<1x16x16x4xf32>
    %7 = vector.shape_cast %6 : vector<1x16x16x4xf32> to vector<16x16x4xf32>
    %8 = vector.shape_cast %7 : vector<16x16x4xf32> to vector<256x4xf32>
    %c0_10 = arith.constant 0 : index
    %c4 = arith.constant 4 : index
    %9 = vector.load %arg5[%c0_10, %c4] : memref<256x128xf32, #tpu.memory_space<vmem>>, vector<256x4xf32>
    tpu.vector_store %arg5[%c0_10, %c4], %8 {strides = array<i32>} : memref<256x128xf32, #tpu.memory_space<vmem>>, vector<256x4xf32>,
    %c0_11 = arith.constant 0 : index
    %c0_12 = arith.constant 0 : index
    %c2 = arith.constant 2 : index
    %c0_13 = arith.constant 0 : index
    %10 = vector.load %arg1[%c0_11, %c0_12, %c2, %c0_13] : memref<1x18x18x4xf32, #tpu.memory_space<vmem>>, vector<1x16x16x4xf32>
    %11 = vector.shape_cast %10 : vector<1x16x16x4xf32> to vector<16x16x4xf32>
    %12 = vector.shape_cast %11 : vector<16x16x4xf32> to vector<256x4xf32>
    %c0_14 = arith.constant 0 : index
    %c8 = arith.constant 8 : index
    %13 = vector.load %arg5[%c0_14, %c8] : memref<256x128xf32, #tpu.memory_space<vmem>>, vector<256x4xf32>
    tpu.vector_store %arg5[%c0_14, %c8], %12 {strides = array<i32>} : memref<256x128xf32, #tpu.memory_space<vmem>>, vector<256x4xf32>,
    %c0_15 = arith.constant 0 : index
    %c1_16 = arith.constant 1 : index
    %c0_17 = arith.constant 0 : index
    %c0_18 = arith.constant 0 : index
    %14 = vector.load %arg1[%c0_15, %c1_16, %c0_17, %c0_18] : memref<1x18x18x4xf32, #tpu.memory_space<vmem>>, vector<1x16x16x4xf32>
    %15 = vector.shape_cast %14 : vector<1x16x16x4xf32> to vector<16x16x4xf32>
    %16 = vector.shape_cast %15 : vector<16x16x4xf32> to vector<256x4xf32>
    %c0_19 = arith.constant 0 : index
    %c12 = arith.constant 12 : index
    %17 = vector.load %arg5[%c0_19, %c12] : memref<256x128xf32, #tpu.memory_space<vmem>>, vector<256x4xf32>
    tpu.vector_store %arg5[%c0_19, %c12], %16 {strides = array<i32>} : memref<256x128xf32, #tpu.memory_space<vmem>>, vector<256x4xf32>,
    %c0_20 = arith.constant 0 : index
    %c1_21 = arith.constant 1 : index
    %c1_22 = arith.constant 1 : index
    %c0_23 = arith.constant 0 : index
    %18 = vector.load %arg1[%c0_20, %c1_21, %c1_22, %c0_23] : memref<1x18x18x4xf32, #tpu.memory_space<vmem>>, vector<1x16x16x4xf32>
    %19 = vector.shape_cast %18 : vector<1x16x16x4xf32> to vector<16x16x4xf32>
    %20 = vector.shape_cast %19 : vector<16x16x4xf32> to vector<256x4xf32>
    %c0_24 = arith.constant 0 : index
    %c16 = arith.constant 16 : index
    %21 = vector.load %arg5[%c0_24, %c16] : memref<256x128xf32, #tpu.memory_space<vmem>>, vector<256x4xf32>
    tpu.vector_store %arg5[%c0_24, %c16], %20 {strides = array<i32>} : memref<256x128xf32, #tpu.memory_space<vmem>>, vector<256x4xf32>,
    %c0_25 = arith.constant 0 : index
    %c1_26 = arith.constant 1 : index
    %c2_27 = arith.constant 2 : index
    %c0_28 = arith.constant 0 : index
    %22 = vector.load %arg1[%c0_25, %c1_26, %c2_27, %c0_28] : memref<1x18x18x4xf32, #tpu.memory_space<vmem>>, vector<1x16x16x4xf32>
    %23 = vector.shape_cast %22 : vector<1x16x16x4xf32> to vector<16x16x4xf32>
    %24 = vector.shape_cast %23 : vector<16x16x4xf32> to vector<256x4xf32>
    %c0_29 = arith.constant 0 : index
    %c20 = arith.constant 20 : index
    %25 = vector.load %arg5[%c0_29, %c20] : memref<256x128xf32, #tpu.memory_space<vmem>>, vector<256x4xf32>
    tpu.vector_store %arg5[%c0_29, %c20], %24 {strides = array<i32>} : memref<256x128xf32, #tpu.memory_space<vmem>>, vector<256x4xf32>,
    %c0_30 = arith.constant 0 : index
    %c2_31 = arith.constant 2 : index
    %c0_32 = arith.constant 0 : index
    %c0_33 = arith.constant 0 : index
    %26 = vector.load %arg1[%c0_30, %c2_31, %c0_32, %c0_33] : memref<1x18x18x4xf32, #tpu.memory_space<vmem>>, vector<1x16x16x4xf32>
    %27 = vector.shape_cast %26 : vector<1x16x16x4xf32> to vector<16x16x4xf32>
    %28 = vector.shape_cast %27 : vector<16x16x4xf32> to vector<256x4xf32>
    %c0_34 = arith.constant 0 : index
    %c24 = arith.constant 24 : index
    %29 = vector.load %arg5[%c0_34, %c24] : memref<256x128xf32, #tpu.memory_space<vmem>>, vector<256x4xf32>
    tpu.vector_store %arg5[%c0_34, %c24], %28 {strides = array<i32>} : memref<256x128xf32, #tpu.memory_space<vmem>>, vector<256x4xf32>,
    %c0_35 = arith.constant 0 : index
    %c2_36 = arith.constant 2 : index
    %c1_37 = arith.constant 1 : index
    %c0_38 = arith.constant 0 : index
    %30 = vector.load %arg1[%c0_35, %c2_36, %c1_37, %c0_38] : memref<1x18x18x4xf32, #tpu.memory_space<vmem>>, vector<1x16x16x4xf32>
    %31 = vector.shape_cast %30 : vector<1x16x16x4xf32> to vector<16x16x4xf32>
    %32 = vector.shape_cast %31 : vector<16x16x4xf32> to vector<256x4xf32>
    %c0_39 = arith.constant 0 : index
    %c28 = arith.constant 28 : index
    %33 = vector.load %arg5[%c0_39, %c28] : memref<256x128xf32, #tpu.memory_space<vmem>>, vector<256x4xf32>
    tpu.vector_store %arg5[%c0_39, %c28], %32 {strides = array<i32>} : memref<256x128xf32, #tpu.memory_space<vmem>>, vector<256x4xf32>,
    %c0_40 = arith.constant 0 : index
    %c2_41 = arith.constant 2 : index
    %c2_42 = arith.constant 2 : index
    %c0_43 = arith.constant 0 : index
    %34 = vector.load %arg1[%c0_40, %c2_41, %c2_42, %c0_43] : memref<1x18x18x4xf32, #tpu.memory_space<vmem>>, vector<1x16x16x4xf32>
    %35 = vector.shape_cast %34 : vector<1x16x16x4xf32> to vector<16x16x4xf32>
    %36 = vector.shape_cast %35 : vector<16x16x4xf32> to vector<256x4xf32>
    %c0_44 = arith.constant 0 : index
    %c32 = arith.constant 32 : index
    %37 = vector.load %arg5[%c0_44, %c32] : memref<256x128xf32, #tpu.memory_space<vmem>>, vector<256x4xf32>
    tpu.vector_store %arg5[%c0_44, %c32], %36 {strides = array<i32>} : memref<256x128xf32, #tpu.memory_space<vmem>>, vector<256x4xf32>,
    %c0_45 = arith.constant 0 : index
    %c0_46 = arith.constant 0 : index
    %38 = vector.load %arg5[%c0_45, %c0_46] : memref<256x128xf32, #tpu.memory_space<vmem>>, vector<256x128xf32>
    %c0_47 = arith.constant 0 : index
    %c0_48 = arith.constant 0 : index
    %39 = vector.load %arg2[%c0_47, %c0_48] : memref<128x128xf32, #tpu.memory_space<vmem>>, vector<128x128xf32>
    %cst_49 = arith.constant dense<0.000000e+00> : vector<256x128xf32>
    %40 = tpu.matmul %38, %39, %cst_49 {dimension_numbers = #tpu.dot_dimension_numbers<[1], [0], [0], [1], [0, 0, 1, 1], [], []>} : vector<256x128xf32>, vector<128x128xf32>, vector<256x128xf32> -> vector<256x128xf32>
    %c0_50 = arith.constant 0 : index
    %c0_51 = arith.constant 0 : index
    %41 = vector.load %arg3[%c0_50, %c0_51] : memref<1x128xf32, #tpu.memory_space<vmem>>, vector<1x128xf32>
    %42 = vector.broadcast %41 : vector<1x128xf32> to vector<256x128xf32>
    %43 = arith.addf %40, %42 : vector<256x128xf32>
    %cst_52 = arith.constant 0.000000e+00 : f32
    %44 = vector.broadcast %cst_52 : f32 to vector<256x128xf32>
    %45 = arith.maximumf %43, %44 : vector<256x128xf32>
    %cst_53 = arith.constant dense<0.000000e+00> : vector<128xf32>
    %46 = vector.multi_reduction <add>, %45, %cst_53 [0] : vector<256x128xf32> to vector<128xf32>
    %47 = vector.shape_cast %46 : vector<128xf32> to vector<1x128xf32>
    %cst_54 = arith.constant 3.906250e-03 : f32
    %48 = vector.broadcast %cst_54 : f32 to vector<1x128xf32>
    %49 = arith.mulf %47, %48 : vector<1x128xf32>
    %c0_55 = arith.constant 0 : index
    %c0_56 = arith.constant 0 : index
    %c0_57 = arith.constant 0 : index
    %50 = vector.load %arg4[%c0_55, %c0_56, %c0_57] : memref<1x1x128xf32, #tpu.memory_space<vmem>>, vector<1x1x128xf32>
    %51 = vector.shape_cast %50 : vector<1x1x128xf32> to vector<1x128xf32>
    %52 = vector.shape_cast %49 : vector<1x128xf32> to vector<1x1x128xf32>
    tpu.vector_store %arg4[%c0_55, %c0_56, %c0_57], %52 {strides = array<i32>} : memref<1x1x128xf32, #tpu.memory_space<vmem>>, vector<1x1x128xf32>,
    return
  }
  func.func @transform_0(%arg0: i32) -> (i32, i32, i32, i32) {
    %c0_i32 = arith.constant 0 : i32
    %c0_i32_0 = arith.constant 0 : i32
    %c0_i32_1 = arith.constant 0 : i32
    %c0_i32_2 = arith.constant 0 : i32
    return %arg0, %c0_i32, %c0_i32_0, %c0_i32_1 : i32, i32, i32, i32
  }
  func.func @transform_1(%arg0: i32) -> (i32, i32) {
    %c0_i32 = arith.constant 0 : i32
    %c0_i32_0 = arith.constant 0 : i32
    %c0_i32_1 = arith.constant 0 : i32
    return %c0_i32, %c0_i32_0 : i32, i32
  }
  func.func @transform_2(%arg0: i32) -> (i32, i32) {
    %c0_i32 = arith.constant 0 : i32
    %c0_i32_0 = arith.constant 0 : i32
    %c0_i32_1 = arith.constant 0 : i32
    return %c0_i32, %c0_i32_0 : i32, i32
  }
  func.func @transform_3(%arg0: i32) -> (i32, i32, i32) {
    %c0_i32 = arith.constant 0 : i32
    %c0_i32_0 = arith.constant 0 : i32
    %c0_i32_1 = arith.constant 0 : i32
    return %arg0, %c0_i32, %c0_i32_0 : i32, i32, i32
  }
}

</mosaic_0001>

<bundles_post_ra>
// kernel: tpu_custom_call.1
= control target key start
LH: loop header
LB: loop body
LE: loop exit
PB: predicated region body
PF: predicated region fallthrough
CT: control target
= control target key end

     0   :  { %8 = vsyncpa [#allocation4], 0  ;;  %s3871_s0 = inlined_call_operand.vmem [shape: f32[6,18,18,4], index: 0, kind: input, shape index: {}]   ;;  %s3872_s1 = inlined_call_operand.vmem [shape: f32[128,128], index: 1, kind: input, shape index: {}]   ;;  %s3873_s2 = inlined_call_operand.vmem [shape: f32[1,128], index: 2, kind: input, shape index: {}]   ;;  %s3874_s3 = inlined_call_operand.hbm [shape: f32[6,1,128], index: 3, kind: output, shape index: {}]  }
   0x1   :  { %10 = vsyncpa [#allocation4 + $0x1], 0  ;;  %s2750_s12 = smov 0   ;;  %s2752_s13 = smov 0  }
   0x2   :  { %s2754_s14 = smov 0   ;;  %s2756_s15 = smov 0  }
   0x3 LB: > { %s2771_s16 = sadd.s32 4294967295, %s2718_s15   ;;  %s2230_s17 = sadd.s32 4294967294, %s2718_s15   ;;  %s2718_s15 = sphi %s2756_s15, %s3880_s15   ;;  %s2714_s14 = sphi %s2754_s14, %s3879_s14   ;;  %s2710_s13 = sphi %s2752_s13, %s3878_s13   ;;  %s2706_s12 = sphi %s2750_s12, %s3877_s12  }
   0x4   : > { %s2775_s18 = sadd.s32 1, %s2718_s15   ;;  %s91_s19 = sadd.s32 1, %s2714_s14 }
   0x5   : > { %s88_s20 = ssub.s32 %s2718_s15, %s2775_s18  ;;  %p101_p0 = scmp.ne.s32.totalorder %s2714_s14, %s2710_s13 }
   0x6   : > { %p89_p1 = scmp.eq.s32.totalorder %s88_s20, 0  ;;  %p102_p2 = scmp.eq.s32.totalorder %s2771_s16, 5 }
   0x7   : > { %p107_p3 = scmp.ne.s32.totalorder %s2710_s13, %s2706_s12  ;;  %p108_p4 = scmp.eq.s32.totalorder %s2230_s17, 5 }
   0x8   : > { %s2786_s21 = scalar_select %p89_p1, %s2714_s14, %s91_s19  }
   0x9   : > { %p2788_p5 = por %p102_p2, %p101_p0  ;;  %p2792_p6 = por %p108_p4, %p107_p3 }
   0xa   : > { %p2233_p7 = scmp.ge.s32.totalorder %s2718_s15, 1  ;;  %p140_p8 = scmp.lt.s32.totalorder %s2718_s15, 7 }
   0xc   : > { %p141_p9 = pnand %p2233_p7, %p140_p8 }
   0xd   : > { %p163_p10 = scmp.lt.s32.totalorder (!%p141_p9), %s2771_s16, 5  ;;  %v2720_v0 = vmov (!%p141_p9), 0.0   ;;  %s2721_s29 = smov (!%p141_p9), 4   ;;  %vm232_vm0 = vcmask (!%p141_p9), 31744   ;;  %vm425_vm1 = vcmask (!%p141_p9), 64544   ;;  %vm618_vm2 = vcmask (!%p141_p9), 97344  }
   0xe   : > { %144 = sbr.rel (%p141_p9) target bundleno = 908 (0x38c), region = 32  ;;  %170 = vst [vmem:[#allocation2 + $0x10] sm:$0xff] (!%p141_p9), %v2720_v0  ;;  %168 = vst [vmem:[#allocation2] sm:$0xff] (!%p141_p9), %v2720_v0  ;;  %s2722_s30 = smov (!%p141_p9), 8   ;;  %vm812_vm3 = vcmask (!%p141_p9), 130144   ;;  %vm1005_vm4 = vcmask (!%p141_p9), 162944  }
   0xf   : > { %169 = vst [vmem:[#allocation2 + $0x8] sm:$0xff] (!%p141_p9), %v2720_v0  ;;  %171 = vst [vmem:[#allocation2 + $0x18] sm:$0xff] (!%p141_p9), %v2720_v0  ;;  %s2723_s4 = smov (!%p141_p9), 12   ;;  %s2724_s5 = smov (!%p141_p9), 16   ;;  %vm1198_vm5 = vcmask (!%p141_p9), 195744   ;;  %vm1392_vm6 = vcmask (!%p141_p9), 228544  }
  0x10   : > { %172 = vst [vmem:[#allocation2 + $0x20] sm:$0xff] (!%p141_p9), %v2720_v0  ;;  %173 = vst [vmem:[#allocation2 + $0x28] sm:$0xff] (!%p141_p9), %v2720_v0  ;;  %s2725_s10 = smov (!%p141_p9), 20   ;;  %s2728_s11 = smov (!%p141_p9), 32   ;;  %vm1585_vm7 = vcmask (!%p141_p9), 261344   ;;  %vm1778_vm8 = vcmask (!%p141_p9), 294144  }
  0x11   : > { %174 = vst [vmem:[#allocation2 + $0x30] sm:$0xff] (!%p141_p9), %v2720_v0  ;;  %175 = vst [vmem:[#allocation2 + $0x38] sm:$0xff] (!%p141_p9), %v2720_v0 }
  0x12   : > { %176 = vst [vmem:[#allocation2 + $0x40] sm:$0xff] (!%p141_p9), %v2720_v0  ;;  %177 = vst [vmem:[#allocation2 + $0x48] sm:$0xff] (!%p141_p9), %v2720_v0 }
  0x13   : > { %178 = vst [vmem:[#allocation2 + $0x50] sm:$0xff] (!%p141_p9), %v2720_v0  ;;  %179 = vst [vmem:[#allocation2 + $0x58] sm:$0xff] (!%p141_p9), %v2720_v0 }
  0x14   : > { %180 = vst [vmem:[#allocation2 + $0x60] sm:$0xff] (!%p141_p9), %v2720_v0  ;;  %181 = vst [vmem:[#allocation2 + $0x68] sm:$0xff] (!%p141_p9), %v2720_v0 }
  0x15   : > { %182 = vst [vmem:[#allocation2 + $0x70] sm:$0xff] %v2720_v0  ;;  %183 = vst [vmem:[#allocation2 + $0x78] sm:$0xff] %v2720_v0  ;;  %s164_s24 = scalar_select %p163_p10, %s2771_s16, 5 }
  0x16   : > { %184 = vst [vmem:[#allocation2 + $0x80] sm:$0xff] %v2720_v0  ;;  %185 = vst [vmem:[#allocation2 + $0x88] sm:$0xff] %v2720_v0 }
  0x17   : > { %186 = vst [vmem:[#allocation2 + $0x90] sm:$0xff] %v2720_v0  ;;  %187 = vst [vmem:[#allocation2 + $0x98] sm:$0xff] %v2720_v0  ;;  %s2607_s25 = smul.u32 432, %s164_s24  ;;  %s2726_s24 = smov 24  }
  0x18   : > { %188 = vst [vmem:[#allocation2 + $0xa0] sm:$0xff] %v2720_v0  ;;  %189 = vst [vmem:[#allocation2 + $0xa8] sm:$0xff] %v2720_v0 }
  0x19   : > { %190 = vst [vmem:[#allocation2 + $0xb0] sm:$0xff] %v2720_v0  ;;  %191 = vst [vmem:[#allocation2 + $0xb8] sm:$0xff] %v2720_v0  ;;  %s2805_s28 = scalar_lea.vmem %s3871_s0, %s2607_s25 }
  0x1a   : > { %192 = vst [vmem:[#allocation2 + $0xc0] sm:$0xff] %v2720_v0  ;;  %193 = vst [vmem:[#allocation2 + $0xc8] sm:$0xff] %v2720_v0  ;;  %v2808_v1 = vld [vmem:[%s2805_s28 + $0x19] sm:$0xff]  ;;  %v265_v2 = vld [vmem:[%s2805_s28 + $0x1] sm:$0xff] }
  0x1b   : > { %194 = vst [vmem:[#allocation2 + $0xd0] sm:$0xff] %v2720_v0  ;;  %195 = vst [vmem:[#allocation2 + $0xd8] sm:$0xff] %v2720_v0  ;;  %333 = vrot.lane.b32.xlu1 %v2808_v1, %s2721_s29  ;;  %329 = vrot.lane.b32.xlu0 %v265_v2, %s2721_s29  ;;  %v2815_v3 = vld [vmem:[%s2805_s28 + $0x21] sm:$0xff]  ;;  %v266_v4 = vld [vmem:[%s2805_s28 + $0x9] sm:$0xff] }
  0x1c   : > { %196 = vst [vmem:[#allocation2 + $0xe0] sm:$0xff] %v2720_v0  ;;  %197 = vst [vmem:[#allocation2 + $0xe8] sm:$0xff] %v2720_v0  ;;  %v2822_v5 = vld [vmem:[%s2805_s28 + $0x39] sm:$0xff]  ;;  %v2825_v6 = vld [vmem:[%s2805_s28 + $0x31] sm:$0xff] }
  0x1d   : > { %198 = vst [vmem:[#allocation2 + $0xf0] sm:$0xff] %v2720_v0  ;;  %199 = vst [vmem:[#allocation2 + $0xf8] sm:$0xff] %v2720_v0  ;;  %v2832_v7 = vld [vmem:[%s2805_s28 + $0x51] sm:$0xff]  ;;  %v2835_v8 = vld [vmem:[%s2805_s28 + $0x49] sm:$0xff] }
  0x1e   : > { %v2842_v9 = vld [vmem:[%s2805_s28 + $0x69] sm:$0xff]  ;;  %v2845_v10 = vld [vmem:[%s2805_s28 + $0x61] sm:$0xff]  ;;  %v2855_v12 = vld [vmem:[%s2805_s28 + $0x79] sm:$0xff] }
  0x1f   : > { %335 = vrot.lane.b32.xlu1 %v2815_v3, %s2721_s29  ;;  %331 = vrot.lane.b32.xlu0 %v266_v4, %s2721_s29  ;;  %v2852_v11 = vld [vmem:[%s2805_s28 + $0x81] sm:$0xff]  ;;  %v2862_v13 = vld [vmem:[%s2805_s28 + $0x18] sm:$0xff] }
  0x20   : > { %v200_v14 = vld [vmem:[%s2805_s28] sm:$0xff]  ;;  %v2869_v16 = vld [vmem:[%s2805_s28 + $0x91] sm:$0xff]  ;;  %235 = vst.msk [vmem:[#allocation2 + $0x10] sm:$0xff] %vm232_vm0, %v2862_v13  ;;  %v201_v18 = vld [vmem:[%s2805_s28 + $0x8] sm:$0xff] }
  0x21   : > { %v2866_v15 = vld [vmem:[%s2805_s28 + $0x99] sm:$0xff]  ;;  %233 = vst.msk [vmem:[#allocation2] sm:$0xff] %vm232_vm0, %v200_v14  ;;  %v280_v19 = vld [vmem:[%s2805_s28 + $0xb1] sm:$0xff]  ;;  %234 = vst.msk [vmem:[#allocation2 + $0x8] sm:$0xff] %vm232_vm0, %v201_v18 }
  0x22   : > { %v2875_v17 = vld [vmem:[%s2805_s28 + $0x20] sm:$0xff]  ;;  %v2883_v20 = vld [vmem:[%s2805_s28 + $0x38] sm:$0xff]  ;;  %v2886_v21 = vld [vmem:[%s2805_s28 + $0x30] sm:$0xff] }
  0x23   : > { %339 = vrot.lane.b32.xlu1 %v2822_v5, %s2721_s29  ;;  %337 = vrot.lane.b32.xlu0 %v2825_v6, %s2721_s29  ;;  %236 = vst.msk [vmem:[#allocation2 + $0x18] sm:$0xff] %vm232_vm0, %v2875_v17  ;;  %v2893_v22 = vld [vmem:[%s2805_s28 + $0xa9] sm:$0xff]  ;;  %238 = vst.msk [vmem:[#allocation2 + $0x28] sm:$0xff] %vm232_vm0, %v2883_v20  ;;  %v2911_v26 = vld [vmem:[%s2805_s28 + $0x60] sm:$0xff] }
  0x24   : > { %237 = vst.msk [vmem:[#allocation2 + $0x20] sm:$0xff] %vm232_vm0, %v2886_v21  ;;  %v2900_v23 = vld [vmem:[%s2805_s28 + $0x50] sm:$0xff]  ;;  %v2905_v24 = vld [vmem:[%s2805_s28 + $0x48] sm:$0xff]  ;;  %241 = vst.msk [vmem:[#allocation2 + $0x40] sm:$0xff] %vm232_vm0, %v2911_v26 }
  0x25   : > { %240 = vst.msk [vmem:[#allocation2 + $0x38] sm:$0xff] %vm232_vm0, %v2900_v23  ;;  %v2908_v25 = vld [vmem:[%s2805_s28 + $0x68] sm:$0xff]  ;;  %239 = vst.msk [vmem:[#allocation2 + $0x30] sm:$0xff] %vm232_vm0, %v2905_v24  ;;  %v2920_v27 = vld [vmem:[%s2805_s28 + $0x80] sm:$0xff] }
  0x26   : > { %242 = vst.msk [vmem:[#allocation2 + $0x48] sm:$0xff] %vm232_vm0, %v2908_v25  ;;  %v2923_v28 = vld [vmem:[%s2805_s28 + $0x78] sm:$0xff]  ;;  %v282_v30 = vld [vmem:[%s2805_s28 + $0xc9] sm:$0xff]  ;;  %v281_v31 = vld [vmem:[%s2805_s28 + $0xc1] sm:$0xff] }
  0x27   : > { %343 = vrot.lane.b32.xlu1 %v2832_v7, %s2721_s29  ;;  %341 = vrot.lane.b32.xlu0 %v2835_v8, %s2721_s29  ;;  %v2926_v29 = vld [vmem:[%s2805_s28 + $0x98] sm:$0xff]  ;;  %244 = vst.msk [vmem:[#allocation2 + $0x58] sm:$0xff] %vm232_vm0, %v2920_v27  ;;  %243 = vst.msk [vmem:[#allocation2 + $0x50] sm:$0xff] %vm232_vm0, %v2923_v28  ;;  %v2937_v32 = vld [vmem:[%s2805_s28 + $0x90] sm:$0xff] }
  0x28   : > { %246 = vst.msk [vmem:[#allocation2 + $0x68] sm:$0xff] %vm232_vm0, %v2926_v29  ;;  %v2940_v33 = vld [vmem:[%s2805_s28 + $0xb0] sm:$0xff]  ;;  %v2943_v34 = vld [vmem:[%s2805_s28 + $0xa8] sm:$0xff]  ;;  %245 = vst.msk [vmem:[#allocation2 + $0x60] sm:$0xff] %vm232_vm0, %v2937_v32 }
  0x29   : > { %248 = vst.msk [vmem:[#allocation2 + $0x78] sm:$0xff] %vm232_vm0, %v2940_v33  ;;  %247 = vst.msk [vmem:[#allocation2 + $0x70] sm:$0xff] %vm232_vm0, %v2943_v34  ;;  %v2955_v35 = vld [vmem:[%s2805_s28 + $0xc8] sm:$0xff]  ;;  %v2958_v36 = vld [vmem:[%s2805_s28 + $0xc0] sm:$0xff] }
  0x2a   : > { %250 = vst.msk [vmem:[#allocation2 + $0x88] sm:$0xff] %vm232_vm0, %v2955_v35  ;;  %249 = vst.msk [vmem:[#allocation2 + $0x80] sm:$0xff] %vm232_vm0, %v2958_v36  ;;  %v2965_v37 = vld [vmem:[%s2805_s28 + $0xe0] sm:$0xff]  ;;  %v2968_v38 = vld [vmem:[%s2805_s28 + $0xd8] sm:$0xff] }
  0x2b   : > { %347 = vrot.lane.b32.xlu1 %v2842_v9, %s2721_s29  ;;  %345 = vrot.lane.b32.xlu0 %v2845_v10, %s2721_s29  ;;  %v2971_v39 = vld [vmem:[%s2805_s28 + $0xf8] sm:$0xff]  ;;  %252 = vst.msk [vmem:[#allocation2 + $0x98] sm:$0xff] %vm232_vm0, %v2965_v37  ;;  %251 = vst.msk [vmem:[#allocation2 + $0x90] sm:$0xff] %vm232_vm0, %v2968_v38  ;;  %v2980_v40 = vld [vmem:[%s2805_s28 + $0xf0] sm:$0xff] }
  0x2c   : > { %254 = vst.msk [vmem:[#allocation2 + $0xa8] sm:$0xff] %vm232_vm0, %v2971_v39  ;;  %v2983_v41 = vld [vmem:[%s2805_s28 + $0x110] sm:$0xff]  ;;  %v2986_v42 = vld [vmem:[%s2805_s28 + $0x108] sm:$0xff]  ;;  %253 = vst.msk [vmem:[#allocation2 + $0xa0] sm:$0xff] %vm232_vm0, %v2980_v40 }
  0x2d   : > { %256 = vst.msk [vmem:[#allocation2 + $0xb8] sm:$0xff] %vm232_vm0, %v2983_v41  ;;  %255 = vst.msk [vmem:[#allocation2 + $0xb0] sm:$0xff] %vm232_vm0, %v2986_v42  ;;  %v284_v43 = vld [vmem:[%s2805_s28 + $0xe1] sm:$0xff]  ;;  %v283_v44 = vld [vmem:[%s2805_s28 + $0xd9] sm:$0xff] }
  0x2e   : > { %v224_v45 = vld [vmem:[%s2805_s28 + $0x120] sm:$0xff]  ;;  %v225_v46 = vld [vmem:[%s2805_s28 + $0x128] sm:$0xff]  ;;  %v285_v48 = vld [vmem:[%s2805_s28 + $0xf1] sm:$0xff] }
  0x2f   : > { %351 = vrot.lane.b32.xlu1 %v2852_v11, %s2721_s29  ;;  %349 = vrot.lane.b32.xlu0 %v2855_v12, %s2721_s29  ;;  %257 = vst.msk [vmem:[#allocation2 + $0xc0] sm:$0xff] %vm232_vm0, %v224_v45  ;;  %258 = vst.msk [vmem:[#allocation2 + $0xc8] sm:$0xff] %vm232_vm0, %v225_v46  ;;  %v286_v47 = vld [vmem:[%s2805_s28 + $0xf9] sm:$0xff]  ;;  %v288_v51 = vld [vmem:[%s2805_s28 + $0x111] sm:$0xff] }
  0x30   : > { %v226_v49 = vld [vmem:[%s2805_s28 + $0x138] sm:$0xff]  ;;  %v227_v50 = vld [vmem:[%s2805_s28 + $0x140] sm:$0xff]  ;;  %v287_v52 = vld [vmem:[%s2805_s28 + $0x109] sm:$0xff] }
  0x31   : > { %259 = vst.msk [vmem:[#allocation2 + $0xd0] sm:$0xff] %vm232_vm0, %v226_v49  ;;  %260 = vst.msk [vmem:[#allocation2 + $0xd8] sm:$0xff] %vm232_vm0, %v227_v50  ;;  %v228_v53 = vld [vmem:[%s2805_s28 + $0x150] sm:$0xff]  ;;  %v229_v54 = vld [vmem:[%s2805_s28 + $0x158] sm:$0xff] }
  0x32   : > { %261 = vst.msk [vmem:[#allocation2 + $0xe0] sm:$0xff] %vm232_vm0, %v228_v53  ;;  %262 = vst.msk [vmem:[#allocation2 + $0xe8] sm:$0xff] %vm232_vm0, %v229_v54  ;;  %v290_v55 = vld [vmem:[%s2805_s28 + $0x129] sm:$0xff]  ;;  %v289_v56 = vld [vmem:[%s2805_s28 + $0x121] sm:$0xff] }
  0x33   : > { %355 = vrot.lane.b32.xlu1 %v2866_v15, %s2721_s29  ;;  %353 = vrot.lane.b32.xlu0 %v2869_v16, %s2721_s29  ;;  %v230_v57 = vld [vmem:[%s2805_s28 + $0x168] sm:$0xff]  ;;  %v231_v58 = vld [vmem:[%s2805_s28 + $0x170] sm:$0xff] }
  0x34   : > { %263 = vst.msk [vmem:[#allocation2 + $0xf0] sm:$0xff] %vm232_vm0, %v230_v57  ;;  %264 = vst.msk [vmem:[#allocation2 + $0xf8] sm:$0xff] %vm232_vm0, %v231_v58  ;;  %v292_v59 = vld [vmem:[%s2805_s28 + $0x141] sm:$0xff]  ;;  %v291_v60 = vld [vmem:[%s2805_s28 + $0x139] sm:$0xff] }
  0x35   : > { %v294_v61 = vld [vmem:[%s2805_s28 + $0x159] sm:$0xff]  ;;  %v293_v62 = vld [vmem:[%s2805_s28 + $0x151] sm:$0xff]  ;;  %v295_v0 = vld [vmem:[%s2805_s28 + $0x169] sm:$0xff] }
  0x36   : > { %v296_v63 = vld [vmem:[%s2805_s28 + $0x171] sm:$0xff]  ;;  %v458_v4 = vld [vmem:[%s2805_s28 + $0x2] sm:$0xff]  ;;  %v3048_v18 = vld [vmem:[%s2805_s28 + $0x1a] sm:$0xff] }
  0x37   : > { %359 = vrot.lane.b32.xlu1 %v280_v19, %s2721_s29  ;;  %357 = vrot.lane.b32.xlu0 %v2893_v22, %s2721_s29  ;;  %v459_v2 = vld [vmem:[%s2805_s28 + $0xa] sm:$0xff]  ;;  %v3045_v14 = vld [vmem:[%s2805_s28 + $0x22] sm:$0xff] }
  0x38   : > { %v3055_v19 = vld [vmem:[%s2805_s28 + $0x3a] sm:$0xff]  ;;  %v3078_v45 = vld [vmem:[%s2805_s28 + $0x62] sm:$0xff]  ;;  %v3098_v49 = vld [vmem:[%s2805_s28 + $0x92] sm:$0xff] }
  0x39   : > { %v3085_v46 = vld [vmem:[%s2805_s28 + $0x82] sm:$0xff]  ;;  %v3105_v50 = vld [vmem:[%s2805_s28 + $0xb2] sm:$0xff] }
  0x3a   : > { %v474_v53 = vld [vmem:[%s2805_s28 + $0xc2] sm:$0xff]  ;;  %v478_v57 = vld [vmem:[%s2805_s28 + $0xf2] sm:$0xff] }
  0x3b   : > { %363 = vrot.lane.b32.xlu1 %v282_v30, %s2721_s29  ;;  %361 = vrot.lane.b32.xlu0 %v281_v31, %s2721_s29  ;;  %v3058_v30 = vld [vmem:[%s2805_s28 + $0x32] sm:$0xff]  ;;  %v477_v54 = vld [vmem:[%s2805_s28 + $0xe2] sm:$0xff] }
  0x3c   : > { %v3065_v31 = vld [vmem:[%s2805_s28 + $0x52] sm:$0xff] }
  0x3d   : > { %v481_v58 = vld [vmem:[%s2805_s28 + $0x112] sm:$0xff] }
  0x3f   : > { %367 = vrot.lane.b32.xlu1 %v284_v43, %s2721_s29  ;;  %365 = vrot.lane.b32.xlu0 %v283_v44, %s2721_s29  ;;  %v3068_v43 = vld [vmem:[%s2805_s28 + $0x4a] sm:$0xff] }
  0x40   : > { %v3075_v44 = vld [vmem:[%s2805_s28 + $0x6a] sm:$0xff] }
  0x43   : > { %371 = vrot.lane.b32.xlu1 %v286_v47, %s2721_s29  ;;  %369 = vrot.lane.b32.xlu0 %v285_v48, %s2721_s29  ;;  %v3088_v47 = vld [vmem:[%s2805_s28 + $0x7a] sm:$0xff] }
  0x44   : > { %v3095_v48 = vld [vmem:[%s2805_s28 + $0x9a] sm:$0xff] }
  0x47   : > { %375 = vrot.lane.b32.xlu1 %v288_v51, %s2721_s29  ;;  %373 = vrot.lane.b32.xlu0 %v287_v52, %s2721_s29  ;;  %v3108_v51 = vld [vmem:[%s2805_s28 + $0xaa] sm:$0xff] }
  0x48   : > { %v475_v52 = vld [vmem:[%s2805_s28 + $0xca] sm:$0xff] }
  0x4b   : > { %379 = vrot.lane.b32.xlu1 %v290_v55, %s2721_s29  ;;  %377 = vrot.lane.b32.xlu0 %v289_v56, %s2721_s29  ;;  %v476_v55 = vld [vmem:[%s2805_s28 + $0xda] sm:$0xff] }
  0x4c   : > { %v479_v56 = vld [vmem:[%s2805_s28 + $0xfa] sm:$0xff] }
  0x4f   : > { %383 = vrot.lane.b32.xlu1 %v292_v59, %s2721_s29  ;;  %381 = vrot.lane.b32.xlu0 %v291_v60, %s2721_s29  ;;  %v480_v59 = vld [vmem:[%s2805_s28 + $0x10a] sm:$0xff] }
  0x50   : > { %v483_v60 = vld [vmem:[%s2805_s28 + $0x12a] sm:$0xff] }
  0x53   : > { %387 = vrot.lane.b32.xlu1 %v294_v61, %s2721_s29  ;;  %385 = vrot.lane.b32.xlu0 %v293_v62, %s2721_s29  ;;  %v482_v61 = vld [vmem:[%s2805_s28 + $0x122] sm:$0xff] }
  0x54   : > { %v485_v62 = vld [vmem:[%s2805_s28 + $0x142] sm:$0xff] }
  0x57   : > { %391 = vrot.lane.b32.xlu1 %v296_v63, %s2721_s29  ;;  %389 = vrot.lane.b32.xlu0 %v295_v0, %s2721_s29  ;;  %v484_v63 = vld [vmem:[%s2805_s28 + $0x13a] sm:$0xff] }
  0x5b   : > { %524 = vrot.lane.b32.xlu1 %v459_v2, %s2722_s30  ;;  %522 = vrot.lane.b32.xlu0 %v458_v4, %s2722_s30  ;;  %v487_v4 = vld [vmem:[%s2805_s28 + $0x15a] sm:$0xff] }
  0x5f   : > { %528 = vrot.lane.b32.xlu1 %v3045_v14, %s2722_s30  ;;  %526 = vrot.lane.b32.xlu0 %v3048_v18, %s2722_s30 }
  0x63   : > { %532 = vrot.lane.b32.xlu1 %v3055_v19, %s2722_s30  ;;  %530 = vrot.lane.b32.xlu0 %v3058_v30, %s2722_s30 }
  0x67   : > { %536 = vrot.lane.b32.xlu1 %v3065_v31, %s2722_s30  ;;  %534 = vrot.lane.b32.xlu0 %v3068_v43, %s2722_s30 }
  0x6b   : > { %540 = vrot.lane.b32.xlu1 %v3075_v44, %s2722_s30  ;;  %538 = vrot.lane.b32.xlu0 %v3078_v45, %s2722_s30 }
  0x6f   : > { %544 = vrot.lane.b32.xlu1 %v3085_v46, %s2722_s30  ;;  %542 = vrot.lane.b32.xlu0 %v3088_v47, %s2722_s30 }
  0x73   : > { %548 = vrot.lane.b32.xlu1 %v3095_v48, %s2722_s30  ;;  %546 = vrot.lane.b32.xlu0 %v3098_v49, %s2722_s30 }
  0x77   : > { %552 = vrot.lane.b32.xlu1 %v3105_v50, %s2722_s30  ;;  %550 = vrot.lane.b32.xlu0 %v3108_v51, %s2722_s30 }
  0x7b   : > { %556 = vrot.lane.b32.xlu1 %v475_v52, %s2722_s30  ;;  %554 = vrot.lane.b32.xlu0 %v474_v53, %s2722_s30  ;;  %v486_v52 = vld [vmem:[%s2805_s28 + $0x152] sm:$0xff] }
  0x7f   : > { %560 = vrot.lane.b32.xlu1 %v477_v54, %s2722_s30  ;;  %558 = vrot.lane.b32.xlu0 %v476_v55, %s2722_s30  ;;  %v489_v55 = vld [vmem:[%s2805_s28 + $0x172] sm:$0xff] }
  0x83   : > { %564 = vrot.lane.b32.xlu1 %v479_v56, %s2722_s30  ;;  %562 = vrot.lane.b32.xlu0 %v478_v57, %s2722_s30  ;;  %v488_v56 = vld [vmem:[%s2805_s28 + $0x16a] sm:$0xff] }
  0x87   : > { %568 = vrot.lane.b32.xlu1 %v481_v58, %s2722_s30  ;;  %566 = vrot.lane.b32.xlu0 %v480_v59, %s2722_s30 }
  0x8b   : > { %572 = vrot.lane.b32.xlu1 %v483_v60, %s2722_s30  ;;  %570 = vrot.lane.b32.xlu0 %v482_v61, %s2722_s30  ;;  %v1843_v61 = vld [vmem:[%s3872_s1] sm:$0xff] }
  0x8d   : > { %v334_v0 = vpop.permute.xlu1 %333  ;;  %v330_v2 = vpop.permute.xlu0 %329 }
  0x8e   : > { %428 = vst.msk [vmem:[#allocation2 + $0x10] sm:$0xff] %vm425_vm1, %v334_v0  ;;  %426 = vst.msk [vmem:[#allocation2] sm:$0xff] %vm425_vm1, %v330_v2 }
  0x8f   : > { %576 = vrot.lane.b32.xlu1 %v485_v62, %s2722_s30  ;;  %574 = vrot.lane.b32.xlu0 %v484_v63, %s2722_s30  ;;  %v1844_v62 = vld [vmem:[%s3872_s1 + $0x8] sm:$0xff] }
  0x90   : > { %v2559_v63 = vpack.c.bf16 %v1844_v62, %v1843_v61 }
  0x91   : > { %v336_v53 = vpop.permute.xlu1 %335  ;;  %v332_v54 = vpop.permute.xlu0 %331 }
  0x92   : > { %429 = vst.msk [vmem:[#allocation2 + $0x18] sm:$0xff] %vm425_vm1, %v336_v53  ;;  %427 = vst.msk [vmem:[#allocation2 + $0x8] sm:$0xff] %vm425_vm1, %v332_v54  ;;  %2560 = vmatprep.subr.bf16.mxu0 %v2559_v63  ;;  %2591 = vmatprep.subr.bf16.mxu1 %v2559_v63  ;;  %v1847_v54 = vld [vmem:[%s3872_s1 + $0x20] sm:$0xff] }
  0x93   : > { %580 = vrot.lane.b32.xlu1 %v487_v4, %s2722_s30  ;;  %578 = vrot.lane.b32.xlu0 %v486_v52, %s2722_s30 }
  0x94   : > { %2562 = vmatpush3.bf16.msra.mxu0 %v2559_v63  ;;  %2599 = vmatpush3.bf16.msra.mxu1 %v2559_v63 }
  0x95   : > { %v340_v57 = vpop.permute.xlu1 %339  ;;  %v338_v58 = vpop.permute.xlu0 %337 }
  0x96   : > { %431 = vst.msk [vmem:[#allocation2 + $0x28] sm:$0xff] %vm425_vm1, %v340_v57  ;;  %430 = vst.msk [vmem:[#allocation2 + $0x20] sm:$0xff] %vm425_vm1, %v338_v58 }
  0x97   : > { %584 = vrot.lane.b32.xlu1 %v489_v55, %s2722_s30  ;;  %582 = vrot.lane.b32.xlu0 %v488_v56, %s2722_s30  ;;  %v1848_v55 = vld [vmem:[%s3872_s1 + $0x28] sm:$0xff]  ;;  %s2727_s30 = smov 28  }
  0x98   : > { %v2567_v56 = vpack.c.bf16 %v1848_v55, %v1847_v54 }
  0x99   : > { %v344_v59 = vpop.permute.xlu1 %343  ;;  %v342_v60 = vpop.permute.xlu0 %341 }
  0x9a   : > { %433 = vst.msk [vmem:[#allocation2 + $0x38] sm:$0xff] %vm425_vm1, %v344_v59  ;;  %432 = vst.msk [vmem:[#allocation2 + $0x30] sm:$0xff] %vm425_vm1, %v342_v60  ;;  %v1849_v59 = vld [vmem:[%s3872_s1 + $0x30] sm:$0xff]  ;;  %v1850_v60 = vld [vmem:[%s3872_s1 + $0x38] sm:$0xff] }
  0x9b   : > { %718 = vrot.lane.b32.xlu1 %v2875_v17, %s2723_s4  ;;  %716 = vrot.lane.b32.xlu0 %v2862_v13, %s2723_s4  ;;  %v1845_v13 = vld [vmem:[%s3872_s1 + $0x10] sm:$0xff]  ;;  %v1846_v17 = vld [vmem:[%s3872_s1 + $0x18] sm:$0xff]  ;;  %v2571_v63 = vpack.c.bf16 %v1850_v60, %v1849_v59 }
  0x9c   : > { %v2563_v4 = vpack.c.bf16 %v1846_v17, %v1845_v13 }
  0x9d   : > { %v348_v0 = vpop.permute.xlu1 %347  ;;  %v346_v2 = vpop.permute.xlu0 %345 }
  0x9e   : > { %435 = vst.msk [vmem:[#allocation2 + $0x48] sm:$0xff] %vm425_vm1, %v348_v0  ;;  %434 = vst.msk [vmem:[#allocation2 + $0x40] sm:$0xff] %vm425_vm1, %v346_v2  ;;  %2564 = vmatprep.subr.bf16.mxu0 %v2563_v4  ;;  %2592 = vmatprep.subr.bf16.mxu1 %v2563_v4  ;;  %v1851_v0 = vld [vmem:[%s3872_s1 + $0x40] sm:$0xff]  ;;  %v1852_v2 = vld [vmem:[%s3872_s1 + $0x48] sm:$0xff] }
  0x9f   : > { %722 = vrot.lane.b32.xlu1 %v2883_v20, %s2723_s4  ;;  %720 = vrot.lane.b32.xlu0 %v2886_v21, %s2723_s4  ;;  %v2575_v13 = vpack.c.bf16 %v1852_v2, %v1851_v0 }
  0xa0   : > { %2566 = vmatpush3.bf16.msra.mxu0 %v2563_v4  ;;  %2600 = vmatpush3.bf16.msra.mxu1 %v2563_v4 }
  0xa1   : > { %v352_v52 = vpop.permute.xlu1 %351  ;;  %v350_v53 = vpop.permute.xlu0 %349  ;;  %2568 = vmatprep.subr.bf16.mxu0 %v2567_v56  ;;  %2593 = vmatprep.subr.bf16.mxu1 %v2567_v56 }
  0xa2   : > { %437 = vst.msk [vmem:[#allocation2 + $0x58] sm:$0xff] %vm425_vm1, %v352_v52  ;;  %436 = vst.msk [vmem:[#allocation2 + $0x50] sm:$0xff] %vm425_vm1, %v350_v53  ;;  %v1854_v52 = vld [vmem:[%s3872_s1 + $0x58] sm:$0xff] }
  0xa3   : > { %726 = vrot.lane.b32.xlu1 %v2900_v23, %s2723_s4  ;;  %724 = vrot.lane.b32.xlu0 %v2905_v24, %s2723_s4 }
  0xa4   : > { %2570 = vmatpush3.bf16.msra.mxu0 %v2567_v56  ;;  %2601 = vmatpush3.bf16.msra.mxu1 %v2567_v56 }
  0xa5   : > { %v356_v57 = vpop.permute.xlu1 %355  ;;  %v354_v58 = vpop.permute.xlu0 %353  ;;  %2572 = vmatprep.subr.bf16.mxu0 %v2571_v63  ;;  %2594 = vmatprep.subr.bf16.mxu1 %v2571_v63 }
  0xa6   : > { %439 = vst.msk [vmem:[#allocation2 + $0x68] sm:$0xff] %vm425_vm1, %v356_v57  ;;  %438 = vst.msk [vmem:[#allocation2 + $0x60] sm:$0xff] %vm425_vm1, %v354_v58 }
  0xa7   : > { %730 = vrot.lane.b32.xlu1 %v2908_v25, %s2723_s4  ;;  %728 = vrot.lane.b32.xlu0 %v2911_v26, %s2723_s4 }
  0xa8   : > { %2574 = vmatpush3.bf16.msra.mxu0 %v2571_v63  ;;  %2602 = vmatpush3.bf16.msra.mxu1 %v2571_v63 }
  0xa9   : > { %v360_v61 = vpop.permute.xlu1 %359  ;;  %v358_v62 = vpop.permute.xlu0 %357  ;;  %2576 = vmatprep.subr.bf16.mxu0 %v2575_v13  ;;  %2595 = vmatprep.subr.bf16.mxu1 %v2575_v13 }
  0xaa   : > { %441 = vst.msk [vmem:[#allocation2 + $0x78] sm:$0xff] %vm425_vm1, %v360_v61  ;;  %440 = vst.msk [vmem:[#allocation2 + $0x70] sm:$0xff] %vm425_vm1, %v358_v62 }
  0xab   : > { %909 = vrot.lane.b32.xlu1 %v2808_v1, %s2724_s5  ;;  %732 = vrot.lane.b32.xlu0 %v2923_v28, %s2723_s4  ;;  %v1853_v1 = vld [vmem:[%s3872_s1 + $0x50] sm:$0xff] }
  0xac   : > { %v2579_v53 = vpack.c.bf16 %v1854_v52, %v1853_v1  ;;  %2578 = vmatpush3.bf16.msra.mxu0 %v2575_v13  ;;  %2603 = vmatpush3.bf16.msra.mxu1 %v2575_v13 }
  0xad   : > { %v364_v17 = vpop.permute.xlu1 %363  ;;  %v362_v4 = vpop.permute.xlu0 %361 }
  0xae   : > { %443 = vst.msk [vmem:[#allocation2 + $0x88] sm:$0xff] %vm425_vm1, %v364_v17  ;;  %442 = vst.msk [vmem:[#allocation2 + $0x80] sm:$0xff] %vm425_vm1, %v362_v4  ;;  %2580 = vmatprep.subr.bf16.mxu0 %v2579_v53  ;;  %2596 = vmatprep.subr.bf16.mxu1 %v2579_v53 }
  0xaf   : > { %1102 = vrot.lane.b32.xlu1 %v3048_v18, %s2725_s10  ;;  %911 = vrot.lane.b32.xlu0 %v2815_v3, %s2724_s5  ;;  %v1855_v3 = vld [vmem:[%s3872_s1 + $0x60] sm:$0xff]  ;;  %v1856_v18 = vld [vmem:[%s3872_s1 + $0x68] sm:$0xff] }
  0xb0   : > { %v2583_v56 = vpack.c.bf16 %v1856_v18, %v1855_v3  ;;  %2582 = vmatpush3.bf16.msra.mxu0 %v2579_v53  ;;  %2604 = vmatpush3.bf16.msra.mxu1 %v2579_v53 }
  0xb1   : > { %v368_v54 = vpop.permute.xlu1 %367  ;;  %v366_v55 = vpop.permute.xlu0 %365 }
  0xb2   : > { %445 = vst.msk [vmem:[#allocation2 + $0x98] sm:$0xff] %vm425_vm1, %v368_v54  ;;  %444 = vst.msk [vmem:[#allocation2 + $0x90] sm:$0xff] %vm425_vm1, %v366_v55  ;;  %2584 = vmatprep.subr.bf16.mxu0 %v2583_v56  ;;  %2597 = vmatprep.subr.bf16.mxu1 %v2583_v56 }
  0xb3   : > { %1296 = vrot.lane.b32.xlu1 %v2886_v21, %s2726_s24  ;;  %1104 = vrot.lane.b32.xlu0 %v3045_v14, %s2725_s10  ;;  %v1857_v21 = vld [vmem:[%s3872_s1 + $0x70] sm:$0xff]  ;;  %v1858_v14 = vld [vmem:[%s3872_s1 + $0x78] sm:$0xff] }
  0xb4   : > { %v2587_v59 = vpack.c.bf16 %v1858_v14, %v1857_v21  ;;  %2586 = vmatpush3.bf16.msra.mxu0 %v2583_v56  ;;  %2605 = vmatpush3.bf16.msra.mxu1 %v2583_v56 }
  0xb5   : > { %v372_v57 = vpop.permute.xlu1 %371  ;;  %v370_v58 = vpop.permute.xlu0 %369 }
  0xb6   : > { %447 = vst.msk [vmem:[#allocation2 + $0xa8] sm:$0xff] %vm425_vm1, %v372_v57  ;;  %446 = vst.msk [vmem:[#allocation2 + $0xa0] sm:$0xff] %vm425_vm1, %v370_v58  ;;  %2588 = vmatprep.subr.bf16.mxu0 %v2587_v59  ;;  %2598 = vmatprep.subr.bf16.mxu1 %v2587_v59 }
  0xb7   : > { %1489 = vrot.lane.b32.xlu1 %v2825_v6, %s2727_s30  ;;  %1298 = vrot.lane.b32.xlu0 %v2883_v20, %s2726_s24 }
  0xb8   : > { %2590 = vmatpush3.bf16.msra.mxu0 %v2587_v59  ;;  %2606 = vmatpush3.bf16.msra.mxu1 %v2587_v59 }
  0xb9   : > { %v376_v60 = vpop.permute.xlu1 %375  ;;  %v374_v61 = vpop.permute.xlu0 %373 }
  0xba   : > { %449 = vst.msk [vmem:[#allocation2 + $0xb8] sm:$0xff] %vm425_vm1, %v376_v60  ;;  %448 = vst.msk [vmem:[#allocation2 + $0xb0] sm:$0xff] %vm425_vm1, %v374_v61 }
  0xbb   : > { %1491 = vrot.lane.b32.xlu1 %v2822_v5, %s2727_s30  ;;  %913 = vrot.lane.b32.xlu0 %v2825_v6, %s2724_s5 }
  0xbd   : > { %v380_v20 = vpop.permute.xlu1 %379  ;;  %v378_v62 = vpop.permute.xlu0 %377 }
  0xbe   : > { %451 = vst.msk [vmem:[#allocation2 + $0xc8] sm:$0xff] %vm425_vm1, %v380_v20  ;;  %450 = vst.msk [vmem:[#allocation2 + $0xc0] sm:$0xff] %vm425_vm1, %v378_v62 }
  0xbf   : > { %915 = vrot.lane.b32.xlu1 %v2822_v5, %s2724_s5  ;;  %1682 = vrot.lane.b32.xlu0 %v3058_v30, %s2728_s11 }
  0xc1   : > { %v384_v63 = vpop.permute.xlu1 %383  ;;  %v382_v0 = vpop.permute.xlu0 %381 }
  0xc2   : > { %453 = vst.msk [vmem:[#allocation2 + $0xd8] sm:$0xff] %vm425_vm1, %v384_v63  ;;  %452 = vst.msk [vmem:[#allocation2 + $0xd0] sm:$0xff] %vm425_vm1, %v382_v0 }
  0xc3   : > { %1684 = vrot.lane.b32.xlu1 %v3055_v19, %s2728_s11  ;;  %1106 = vrot.lane.b32.xlu0 %v3058_v30, %s2725_s10 }
  0xc5   : > { %v388_v6 = vpop.permute.xlu1 %387  ;;  %v386_v2 = vpop.permute.xlu0 %385 }
  0xc6   : > { %455 = vst.msk [vmem:[#allocation2 + $0xe8] sm:$0xff] %vm425_vm1, %v388_v6  ;;  %454 = vst.msk [vmem:[#allocation2 + $0xe0] sm:$0xff] %vm425_vm1, %v386_v2 }
  0xc7   : > { %1300 = vrot.lane.b32.xlu1 %v2905_v24, %s2726_s24  ;;  %1108 = vrot.lane.b32.xlu0 %v3055_v19, %s2725_s10 }
  0xc9   : > { %v392_v5 = vpop.permute.xlu1 %391  ;;  %v390_v13 = vpop.permute.xlu0 %389 }
  0xca   : > { %457 = vst.msk [vmem:[#allocation2 + $0xf8] sm:$0xff] %vm425_vm1, %v392_v5  ;;  %456 = vst.msk [vmem:[#allocation2 + $0xf0] sm:$0xff] %vm425_vm1, %v390_v13 }
  0xcb   : > { %1493 = vrot.lane.b32.xlu1 %v2835_v8, %s2727_s30  ;;  %1302 = vrot.lane.b32.xlu0 %v2900_v23, %s2726_s24 }
  0xcd   : > { %v525_v30 = vpop.permute.xlu1 %524  ;;  %v523_v17 = vpop.permute.xlu0 %522 }
  0xce   : > { %620 = vst.msk [vmem:[#allocation2 + $0x8] sm:$0xff] %vm618_vm2, %v525_v30  ;;  %619 = vst.msk [vmem:[#allocation2] sm:$0xff] %vm618_vm2, %v523_v17 }
  0xcf   : > { %1495 = vrot.lane.b32.xlu1 %v2832_v7, %s2727_s30  ;;  %917 = vrot.lane.b32.xlu0 %v2835_v8, %s2724_s5 }
  0xd1   : > { %v529_v24 = vpop.permute.xlu1 %528  ;;  %v527_v19 = vpop.permute.xlu0 %526 }
  0xd2   : > { %622 = vst.msk [vmem:[#allocation2 + $0x18] sm:$0xff] %vm618_vm2, %v529_v24  ;;  %621 = vst.msk [vmem:[#allocation2 + $0x10] sm:$0xff] %vm618_vm2, %v527_v19 }
  0xd3   : > { %919 = vrot.lane.b32.xlu1 %v2832_v7, %s2724_s5  ;;  %1686 = vrot.lane.b32.xlu0 %v3068_v43, %s2728_s11 }
  0xd5   : > { %v533_v23 = vpop.permute.xlu1 %532  ;;  %v531_v4 = vpop.permute.xlu0 %530 }
  0xd6   : > { %624 = vst.msk [vmem:[#allocation2 + $0x28] sm:$0xff] %vm618_vm2, %v533_v23  ;;  %623 = vst.msk [vmem:[#allocation2 + $0x20] sm:$0xff] %vm618_vm2, %v531_v4 }
  0xd7   : > { %1688 = vrot.lane.b32.xlu1 %v3065_v31, %s2728_s11  ;;  %1110 = vrot.lane.b32.xlu0 %v3068_v43, %s2725_s10 }
  0xd9   : > { %v537_v8 = vpop.permute.xlu1 %536  ;;  %v535_v1 = vpop.permute.xlu0 %534 }
  0xda   : > { %626 = vst.msk [vmem:[#allocation2 + $0x38] sm:$0xff] %vm618_vm2, %v537_v8  ;;  %625 = vst.msk [vmem:[#allocation2 + $0x30] sm:$0xff] %vm618_vm2, %v535_v1  ;;  %v2407_v1 = vld [vmem:[%s2805_s28 + $0xc2] sm:$0xff] }
  0xdb   : > { %1304 = vrot.lane.b32.xlu1 %v2911_v26, %s2726_s24  ;;  %1112 = vrot.lane.b32.xlu0 %v3065_v31, %s2725_s10 }
  0xdd   : > { %v541_v7 = vpop.permute.xlu1 %540  ;;  %v539_v52 = vpop.permute.xlu0 %538 }
  0xde   : > { %628 = vst.msk [vmem:[#allocation2 + $0x48] sm:$0xff] %vm618_vm2, %v541_v7  ;;  %627 = vst.msk [vmem:[#allocation2 + $0x40] sm:$0xff] %vm618_vm2, %v539_v52 }
  0xdf   : > { %1497 = vrot.lane.b32.xlu1 %v2845_v10, %s2727_s30  ;;  %1306 = vrot.lane.b32.xlu0 %v2908_v25, %s2726_s24 }
  0xe1   : > { %v545_v43 = vpop.permute.xlu1 %544  ;;  %v543_v53 = vpop.permute.xlu0 %542 }
  0xe2   : > { %630 = vst.msk [vmem:[#allocation2 + $0x58] sm:$0xff] %vm618_vm2, %v545_v43  ;;  %629 = vst.msk [vmem:[#allocation2 + $0x50] sm:$0xff] %vm618_vm2, %v543_v53 }
  0xe3   : > { %1499 = vrot.lane.b32.xlu1 %v2842_v9, %s2727_s30  ;;  %921 = vrot.lane.b32.xlu0 %v2845_v10, %s2724_s5 }
  0xe5   : > { %v549_v26 = vpop.permute.xlu1 %548  ;;  %v547_v31 = vpop.permute.xlu0 %546 }
  0xe6   : > { %632 = vst.msk [vmem:[#allocation2 + $0x68] sm:$0xff] %vm618_vm2, %v549_v26  ;;  %631 = vst.msk [vmem:[#allocation2 + $0x60] sm:$0xff] %vm618_vm2, %v547_v31 }
  0xe7   : > { %923 = vrot.lane.b32.xlu1 %v2842_v9, %s2724_s5  ;;  %1690 = vrot.lane.b32.xlu0 %v3078_v45, %s2728_s11 }
  0xe9   : > { %v553_v25 = vpop.permute.xlu1 %552  ;;  %v551_v54 = vpop.permute.xlu0 %550 }
  0xea   : > { %634 = vst.msk [vmem:[#allocation2 + $0x78] sm:$0xff] %vm618_vm2, %v553_v25  ;;  %633 = vst.msk [vmem:[#allocation2 + $0x70] sm:$0xff] %vm618_vm2, %v551_v54 }
  0xeb   : > { %1692 = vrot.lane.b32.xlu1 %v3075_v44, %s2728_s11  ;;  %1114 = vrot.lane.b32.xlu0 %v3078_v45, %s2725_s10 }
  0xed   : > { %v557_v10 = vpop.permute.xlu1 %556  ;;  %v555_v55 = vpop.permute.xlu0 %554 }
  0xee   : > { %636 = vst.msk [vmem:[#allocation2 + $0x88] sm:$0xff] %vm618_vm2, %v557_v10  ;;  %635 = vst.msk [vmem:[#allocation2 + $0x80] sm:$0xff] %vm618_vm2, %v555_v55  ;;  %v2377_v55 = vld [vmem:[%s2805_s28 + $0xd9] sm:$0xff] }
  0xef   : > { %1116 = vrot.lane.b32.xlu0 %v3075_v44, %s2725_s10  ;;  %1308 = vrot.lane.b32.xlu1 %v2923_v28, %s2726_s24 }
  0xf1   : > { %v561_v9 = vpop.permute.xlu1 %560  ;;  %v559_v3 = vpop.permute.xlu0 %558 }
  0xf2   : > { %638 = vst.msk [vmem:[#allocation2 + $0x98] sm:$0xff] %vm618_vm2, %v561_v9  ;;  %637 = vst.msk [vmem:[#allocation2 + $0x90] sm:$0xff] %vm618_vm2, %v559_v3 }
  0xf3   : > { %1310 = vrot.lane.b32.xlu0 %v2920_v27, %s2726_s24  ;;  %1501 = vrot.lane.b32.xlu1 %v2855_v12, %s2727_s30 }
  0xf5   : > { %v565_v45 = vpop.permute.xlu1 %564  ;;  %v563_v18 = vpop.permute.xlu0 %562 }
  0xf6   : > { %640 = vst.msk [vmem:[#allocation2 + $0xa8] sm:$0xff] %vm618_vm2, %v565_v45  ;;  %639 = vst.msk [vmem:[#allocation2 + $0xa0] sm:$0xff] %vm618_vm2, %v563_v18 }
  0xf7   : > { %734 = vrot.lane.b32.xlu0 %v2920_v27, %s2723_s4  ;;  %925 = vrot.lane.b32.xlu1 %v2855_v12, %s2724_s5 }
  0xf9   : > { %v569_v28 = vpop.permute.xlu1 %568  ;;  %v567_v44 = vpop.permute.xlu0 %566 }
  0xfa   : > { %642 = vst.msk [vmem:[#allocation2 + $0xb8] sm:$0xff] %vm618_vm2, %v569_v28  ;;  %641 = vst.msk [vmem:[#allocation2 + $0xb0] sm:$0xff] %vm618_vm2, %v567_v44  ;;  %v2409_v44 = vld [vmem:[%s2805_s28 + $0xda] sm:$0xff] }
  0xfb   : > { %1503 = vrot.lane.b32.xlu0 %v2852_v11, %s2727_s30  ;;  %1694 = vrot.lane.b32.xlu1 %v3088_v47, %s2728_s11 }
  0xfd   : > { %v573_v56 = vpop.permute.xlu1 %572  ;;  %v571_v57 = vpop.permute.xlu0 %570 }
  0xfe   : > { %644 = vst.msk [vmem:[#allocation2 + $0xc8] sm:$0xff] %vm618_vm2, %v573_v56  ;;  %643 = vst.msk [vmem:[#allocation2 + $0xc0] sm:$0xff] %vm618_vm2, %v571_v57 }
  0xff   : > { %927 = vrot.lane.b32.xlu0 %v2852_v11, %s2724_s5  ;;  %1118 = vrot.lane.b32.xlu1 %v3088_v47, %s2725_s10 }
 0x101   : > { %v577_v12 = vpop.permute.xlu1 %576  ;;  %v575_v27 = vpop.permute.xlu0 %574 }
 0x102   : > { %646 = vst.msk [vmem:[#allocation2 + $0xd8] sm:$0xff] %vm618_vm2, %v577_v12  ;;  %645 = vst.msk [vmem:[#allocation2 + $0xd0] sm:$0xff] %vm618_vm2, %v575_v27 }
 0x103   : > { %1696 = vrot.lane.b32.xlu0 %v3085_v46, %s2728_s11  ;;  %1120 = vrot.lane.b32.xlu1 %v3085_v46, %s2725_s10 }
 0x105   : > { %v581_v58 = vpop.permute.xlu1 %580  ;;  %v579_v21 = vpop.permute.xlu0 %578 }
 0x106   : > { %648 = vst.msk [vmem:[#allocation2 + $0xe8] sm:$0xff] %vm618_vm2, %v581_v58  ;;  %647 = vst.msk [vmem:[#allocation2 + $0xe0] sm:$0xff] %vm618_vm2, %v579_v21 }
 0x107   : > { %1312 = vrot.lane.b32.xlu0 %v2937_v32, %s2726_s24  ;;  %736 = vrot.lane.b32.xlu1 %v2937_v32, %s2723_s4 }
 0x109   : > { %v585_v11 = vpop.permute.xlu1 %584  ;;  %v583_v47 = vpop.permute.xlu0 %582 }
 0x10a   : > { %650 = vst.msk [vmem:[#allocation2 + $0xf8] sm:$0xff] %vm618_vm2, %v585_v11  ;;  %649 = vst.msk [vmem:[#allocation2 + $0xf0] sm:$0xff] %vm618_vm2, %v583_v47 }
 0x10b   : > { %1314 = vrot.lane.b32.xlu0 %v2926_v29, %s2726_s24  ;;  %1505 = vrot.lane.b32.xlu1 %v2869_v16, %s2727_s30 }
 0x10d   : > { %v719_v46 = vpop.permute.xlu1 %718  ;;  %v717_v14 = vpop.permute.xlu0 %716 }
 0x10e   : > { %814 = vst.msk [vmem:[#allocation2 + $0x8] sm:$0xff] %vm812_vm3, %v719_v46  ;;  %813 = vst.msk [vmem:[#allocation2] sm:$0xff] %vm812_vm3, %v717_v14 }
 0x10f   : > { %738 = vrot.lane.b32.xlu0 %v2926_v29, %s2723_s4  ;;  %929 = vrot.lane.b32.xlu1 %v2869_v16, %s2724_s5 }
 0x111   : > { %v723_v32 = vpop.permute.xlu1 %722  ;;  %v721_v59 = vpop.permute.xlu0 %720 }
 0x112   : > { %816 = vst.msk [vmem:[#allocation2 + $0x18] sm:$0xff] %vm812_vm3, %v723_v32  ;;  %815 = vst.msk [vmem:[#allocation2 + $0x10] sm:$0xff] %vm812_vm3, %v721_v59  ;;  %v2379_v32 = vld [vmem:[%s2805_s28 + $0xf1] sm:$0xff] }
 0x113   : > { %1507 = vrot.lane.b32.xlu0 %v2866_v15, %s2727_s30  ;;  %1698 = vrot.lane.b32.xlu1 %v3098_v49, %s2728_s11 }
 0x115   : > { %v727_v60 = vpop.permute.xlu1 %726  ;;  %v725_v61 = vpop.permute.xlu0 %724 }
 0x116   : > { %818 = vst.msk [vmem:[#allocation2 + $0x28] sm:$0xff] %vm812_vm3, %v727_v60  ;;  %817 = vst.msk [vmem:[#allocation2 + $0x20] sm:$0xff] %vm812_vm3, %v725_v61 }
 0x117   : > { %931 = vrot.lane.b32.xlu0 %v2866_v15, %s2724_s5  ;;  %1122 = vrot.lane.b32.xlu1 %v3098_v49, %s2725_s10 }
 0x119   : > { %v731_v16 = vpop.permute.xlu1 %730  ;;  %v729_v29 = vpop.permute.xlu0 %728 }
 0x11a   : > { %820 = vst.msk [vmem:[#allocation2 + $0x38] sm:$0xff] %vm812_vm3, %v731_v16  ;;  %819 = vst.msk [vmem:[#allocation2 + $0x30] sm:$0xff] %vm812_vm3, %v729_v29  ;;  %v2411_v29 = vld [vmem:[%s2805_s28 + $0xf2] sm:$0xff] }
 0x11b   : > { %1700 = vrot.lane.b32.xlu0 %v3095_v48, %s2728_s11  ;;  %1124 = vrot.lane.b32.xlu1 %v3095_v48, %s2725_s10  ;;  %v2279_v48 = vld [vmem:[%s2805_s28 + $0xa9] sm:$0xff] }
 0x11d   : > { %v910_v20 = vpop.permute.xlu1 %909  ;;  %v733_v62 = vpop.permute.xlu0 %732 }
 0x11e   : > { %1006 = vst.msk [vmem:[#allocation2] sm:$0xff] %vm1005_vm4, %v910_v20 }
 0x11f   : > { %821 = vst.msk [vmem:[#allocation2 + $0x40] sm:$0xff] %vm812_vm3, %v733_v62  ;;  %1316 = vrot.lane.b32.xlu0 %v2943_v34, %s2726_s24  ;;  %740 = vrot.lane.b32.xlu1 %v2943_v34, %s2723_s4  ;;  %v2374_v34 = vld [vmem:[%s2805_s28 + $0xb1] sm:$0xff] }
 0x121   : > { %v1103_v15 = vpop.permute.xlu1 %1102  ;;  %v912_v49 = vpop.permute.xlu0 %911 }
 0x122   : > { %1199 = vst.msk [vmem:[#allocation2] sm:$0xff] %vm1198_vm5, %v1103_v15 }
 0x123   : > { %1007 = vst.msk [vmem:[#allocation2 + $0x8] sm:$0xff] %vm1005_vm4, %v912_v49  ;;  %1318 = vrot.lane.b32.xlu0 %v2940_v33, %s2726_s24  ;;  %1509 = vrot.lane.b32.xlu1 %v2893_v22, %s2727_s30 }
 0x125   : > { %v1297_v63 = vpop.permute.xlu1 %1296  ;;  %v1105_v0 = vpop.permute.xlu0 %1104 }
 0x126   : > { %1393 = vst.msk [vmem:[#allocation2] sm:$0xff] %vm1392_vm6, %v1297_v63 }
 0x127   : > { %1200 = vst.msk [vmem:[#allocation2 + $0x8] sm:$0xff] %vm1198_vm5, %v1105_v0  ;;  %742 = vrot.lane.b32.xlu0 %v2940_v33, %s2723_s4  ;;  %933 = vrot.lane.b32.xlu1 %v2279_v48, %s2724_s5 }
 0x129   : > { %v1490_v6 = vpop.permute.xlu1 %1489  ;;  %v1299_v2 = vpop.permute.xlu0 %1298 }
 0x12a   : > { %1586 = vst.msk [vmem:[#allocation2] sm:$0xff] %vm1585_vm7, %v1490_v6 }
 0x12b   : > { %1394 = vst.msk [vmem:[#allocation2 + $0x8] sm:$0xff] %vm1392_vm6, %v1299_v2  ;;  %1511 = vrot.lane.b32.xlu0 %v2374_v34, %s2727_s30  ;;  %1702 = vrot.lane.b32.xlu1 %v3108_v51, %s2728_s11 }
 0x12d   : > { %v1492_v22 = vpop.permute.xlu1 %1491  ;;  %v914_v5 = vpop.permute.xlu0 %913 }
 0x12e   : > { %1587 = vst.msk [vmem:[#allocation2 + $0x8] sm:$0xff] %vm1585_vm7, %v1492_v22  ;;  %v2381_v22 = vld [vmem:[%s2805_s28 + $0x109] sm:$0xff] }
 0x12f   : > { %1008 = vst.msk [vmem:[#allocation2 + $0x10] sm:$0xff] %vm1005_vm4, %v914_v5  ;;  %935 = vrot.lane.b32.xlu0 %v2374_v34, %s2724_s5  ;;  %1126 = vrot.lane.b32.xlu1 %v3108_v51, %s2725_s10  ;;  %v2375_v51 = vld [vmem:[%s2805_s28 + $0xc1] sm:$0xff] }
 0x131   : > { %v916_v33 = vpop.permute.xlu1 %915  ;;  %v1683_v13 = vpop.permute.xlu0 %1682 }
 0x132   : > { %1009 = vst.msk [vmem:[#allocation2 + $0x18] sm:$0xff] %vm1005_vm4, %v916_v33 }
 0x133   : > { %1779 = vst.msk [vmem:[#allocation2] sm:$0xff] %vm1778_vm8, %v1683_v13  ;;  %1704 = vrot.lane.b32.xlu0 %v3105_v50, %s2728_s11  ;;  %1128 = vrot.lane.b32.xlu1 %v3105_v50, %s2725_s10 }
 0x135   : > { %v1685_v30 = vpop.permute.xlu1 %1684  ;;  %v1107_v17 = vpop.permute.xlu0 %1106 }
 0x136   : > { %1780 = vst.msk [vmem:[#allocation2 + $0x8] sm:$0xff] %vm1778_vm8, %v1685_v30 }
 0x137   : > { %1201 = vst.msk [vmem:[#allocation2 + $0x10] sm:$0xff] %vm1198_vm5, %v1107_v17  ;;  %1320 = vrot.lane.b32.xlu0 %v2958_v36, %s2726_s24  ;;  %744 = vrot.lane.b32.xlu1 %v2958_v36, %s2723_s4  ;;  %v2376_v36 = vld [vmem:[%s2805_s28 + $0xc9] sm:$0xff] }
 0x138   : > { %v2413_v17 = vld [vmem:[%s2805_s28 + $0x10a] sm:$0xff] }
 0x139   : > { %v1301_v24 = vpop.permute.xlu1 %1300  ;;  %v1109_v19 = vpop.permute.xlu0 %1108 }
 0x13a   : > { %v1811_v23 = vld [vmem:[#allocation2] sm:$0xff]  ;;  %1395 = vst.msk [vmem:[#allocation2 + $0x10] sm:$0xff] %vm1392_vm6, %v1301_v24 }
 0x13b   : > { %1202 = vst.msk [vmem:[#allocation2 + $0x18] sm:$0xff] %vm1198_vm5, %v1109_v19  ;;  %2511 = vmatprep.mubr.f32.mxu0 %v1811_v23  ;;  %1322 = vrot.lane.b32.xlu0 %v2955_v35, %s2726_s24 }
 0x13c   : > { %1513 = vrot.lane.b32.xlu1 %v2375_v51, %s2727_s30 }
 0x13d   : > { %v1494_v50 = vpop.permute.xlu1 %1493  ;;  %v1303_v4 = vpop.permute.xlu0 %1302  ;;  %v1812_v8 = vld [vmem:[#allocation2 + $0x8] sm:$0xff] }
 0x13e   : > { %1588 = vst.msk [vmem:[#allocation2 + $0x10] sm:$0xff] %vm1585_vm7, %v1494_v50  ;;  %2512 = vmatmul.mubr.f32.vlgmr.msra.gmra.mrb[0].mxu0 %v1812_v8 }
 0x13f   : > { %1396 = vst.msk [vmem:[#allocation2 + $0x18] sm:$0xff] %vm1392_vm6, %v1303_v4  ;;  %746 = vrot.lane.b32.xlu0 %v2955_v35, %s2723_s4  ;;  %v2408_v35 = vld [vmem:[%s2805_s28 + $0xca] sm:$0xff] }
 0x140   : > { %937 = vrot.lane.b32.xlu1 %v2375_v51, %s2724_s5 }
 0x141   : > { %v1496_v7 = vpop.permute.xlu1 %1495  ;;  %v918_v52 = vpop.permute.xlu0 %917 }
 0x142   : > { %1589 = vst.msk [vmem:[#allocation2 + $0x18] sm:$0xff] %vm1585_vm7, %v1496_v7 }
 0x143   : > { %1010 = vst.msk [vmem:[#allocation2 + $0x20] sm:$0xff] %vm1005_vm4, %v918_v52  ;;  %1515 = vrot.lane.b32.xlu0 %v2376_v36, %s2727_s30 }
 0x144   : > { %1706 = vrot.lane.b32.xlu1 %v2407_v1, %s2728_s11 }
 0x145   : > { %v920_v43 = vpop.permute.xlu1 %919  ;;  %v1687_v53 = vpop.permute.xlu0 %1686 }
 0x146   : > { %1011 = vst.msk [vmem:[#allocation2 + $0x28] sm:$0xff] %vm1005_vm4, %v920_v43  ;;  %v2352_v43 = vld [vmem:[%s2805_s28 + $0x128] sm:$0xff] }
 0x147   : > { %1781 = vst.msk [vmem:[#allocation2 + $0x10] sm:$0xff] %vm1778_vm8, %v1687_v53  ;;  %939 = vrot.lane.b32.xlu0 %v2376_v36, %s2724_s5  ;;  %v2351_v36 = vld [vmem:[%s2805_s28 + $0x120] sm:$0xff] }
 0x148   : > { %1130 = vrot.lane.b32.xlu1 %v2407_v1, %s2725_s10  ;;  %v2383_v53 = vld [vmem:[%s2805_s28 + $0x121] sm:$0xff] }
 0x149   : > { %v1689_v26 = vpop.permute.xlu1 %1688  ;;  %v1111_v31 = vpop.permute.xlu0 %1110 }
 0x14a   : > { %1782 = vst.msk [vmem:[#allocation2 + $0x18] sm:$0xff] %vm1778_vm8, %v1689_v26 }
 0x14b   : > { %1203 = vst.msk [vmem:[#allocation2 + $0x20] sm:$0xff] %vm1198_vm5, %v1111_v31  ;;  %1708 = vrot.lane.b32.xlu0 %v2408_v35, %s2728_s11 }
 0x14c   : > { %1132 = vrot.lane.b32.xlu1 %v2408_v35, %s2725_s10 }
 0x14d   : > { %v1305_v25 = vpop.permute.xlu1 %1304  ;;  %v1113_v54 = vpop.permute.xlu0 %1112 }
 0x14e   : > { %v1813_v10 = vld [vmem:[#allocation2 + $0x10] sm:$0xff]  ;;  %1397 = vst.msk [vmem:[#allocation2 + $0x20] sm:$0xff] %vm1392_vm6, %v1305_v25 }
 0x14f   : > { %1204 = vst.msk [vmem:[#allocation2 + $0x28] sm:$0xff] %vm1198_vm5, %v1113_v54  ;;  %2514 = vmatprep.mubr.f32.mxu0 %v1813_v10  ;;  %1324 = vrot.lane.b32.xlu0 %v2968_v38, %s2726_s24  ;;  %v2384_v54 = vld [vmem:[%s2805_s28 + $0x129] sm:$0xff] }
 0x150   : > { %748 = vrot.lane.b32.xlu1 %v2968_v38, %s2723_s4  ;;  %v2378_v38 = vld [vmem:[%s2805_s28 + $0xe1] sm:$0xff] }
 0x151   : > { %v1498_v9 = vpop.permute.xlu1 %1497  ;;  %v1307_v3 = vpop.permute.xlu0 %1306  ;;  %v1814_v45 = vld [vmem:[#allocation2 + $0x18] sm:$0xff]  ;;  %v2415_v10 = vld [vmem:[%s2805_s28 + $0x122] sm:$0xff] }
 0x152   : > { %1590 = vst.msk [vmem:[#allocation2 + $0x20] sm:$0xff] %vm1585_vm7, %v1498_v9  ;;  %2515 = vmatmul.mubr.f32.gmra.mrb[2].mxu0 %v1814_v45 }
 0x153   : > { %1398 = vst.msk [vmem:[#allocation2 + $0x28] sm:$0xff] %vm1392_vm6, %v1307_v3  ;;  %1326 = vrot.lane.b32.xlu0 %v2965_v37, %s2726_s24 }
 0x154   : > { %1517 = vrot.lane.b32.xlu1 %v2377_v55, %s2727_s30 }
 0x155   : > { %v1500_v18 = vpop.permute.xlu1 %1499  ;;  %v922_v28 = vpop.permute.xlu0 %921 }
 0x156   : > { %1591 = vst.msk [vmem:[#allocation2 + $0x28] sm:$0xff] %vm1585_vm7, %v1500_v18 }
 0x157   : > { %1012 = vst.msk [vmem:[#allocation2 + $0x30] sm:$0xff] %vm1005_vm4, %v922_v28  ;;  %750 = vrot.lane.b32.xlu0 %v2965_v37, %s2723_s4  ;;  %v2410_v37 = vld [vmem:[%s2805_s28 + $0xe2] sm:$0xff]  ;;  %v2416_v28 = vld [vmem:[%s2805_s28 + $0x12a] sm:$0xff] }
 0x158   : > { %941 = vrot.lane.b32.xlu1 %v2377_v55, %s2724_s5 }
 0x159   : > { %v924_v56 = vpop.permute.xlu1 %923  ;;  %v1691_v57 = vpop.permute.xlu0 %1690 }
 0x15a   : > { %1013 = vst.msk [vmem:[#allocation2 + $0x38] sm:$0xff] %vm1005_vm4, %v924_v56  ;;  %v2353_v56 = vld [vmem:[%s2805_s28 + $0x138] sm:$0xff] }
 0x15b   : > { %1783 = vst.msk [vmem:[#allocation2 + $0x20] sm:$0xff] %vm1778_vm8, %v1691_v57  ;;  %1519 = vrot.lane.b32.xlu0 %v2378_v38, %s2727_s30 }
 0x15c   : > { %1710 = vrot.lane.b32.xlu1 %v2409_v44, %s2728_s11 }
 0x15d   : > { %v1693_v12 = vpop.permute.xlu1 %1692  ;;  %v1115_v27 = vpop.permute.xlu0 %1114 }
 0x15e   : > { %1784 = vst.msk [vmem:[#allocation2 + $0x28] sm:$0xff] %vm1778_vm8, %v1693_v12 }
 0x15f   : > { %1205 = vst.msk [vmem:[#allocation2 + $0x30] sm:$0xff] %vm1198_vm5, %v1115_v27  ;;  %943 = vrot.lane.b32.xlu0 %v2378_v38, %s2724_s5 }
 0x160   : > { %1134 = vrot.lane.b32.xlu1 %v2409_v44, %s2725_s10 }
 0x161   : > { %v1117_v58 = vpop.permute.xlu0 %1116  ;;  %v1309_v21 = vpop.permute.xlu1 %1308 }
 0x162   : > { %v1815_v11 = vld [vmem:[#allocation2 + $0x20] sm:$0xff]  ;;  %1206 = vst.msk [vmem:[#allocation2 + $0x38] sm:$0xff] %vm1198_vm5, %v1117_v58 }
 0x163   : > { %1399 = vst.msk [vmem:[#allocation2 + $0x30] sm:$0xff] %vm1392_vm6, %v1309_v21  ;;  %2517 = vmatprep.mubr.f32.mxu0 %v1815_v11  ;;  %1712 = vrot.lane.b32.xlu0 %v2410_v37, %s2728_s11  ;;  %v2385_v58 = vld [vmem:[%s2805_s28 + $0x139] sm:$0xff] }
 0x164   : > { %1136 = vrot.lane.b32.xlu1 %v2410_v37, %s2725_s10  ;;  %v2354_v37 = vld [vmem:[%s2805_s28 + $0x140] sm:$0xff] }
 0x165   : > { %v1311_v47 = vpop.permute.xlu0 %1310  ;;  %v1502_v46 = vpop.permute.xlu1 %1501  ;;  %v1816_v14 = vld [vmem:[#allocation2 + $0x28] sm:$0xff] }
 0x166   : > { %1400 = vst.msk [vmem:[#allocation2 + $0x38] sm:$0xff] %vm1392_vm6, %v1311_v47  ;;  %2518 = vmatmul.mubr.f32.gmra.mrb[4].mxu0 %v1816_v14  ;;  %v2386_v14 = vld [vmem:[%s2805_s28 + $0x141] sm:$0xff] }
 0x167   : > { %1592 = vst.msk [vmem:[#allocation2 + $0x30] sm:$0xff] %vm1585_vm7, %v1502_v46  ;;  %1328 = vrot.lane.b32.xlu0 %v2980_v40, %s2726_s24 }
 0x168   : > { %752 = vrot.lane.b32.xlu1 %v2980_v40, %s2723_s4  ;;  %v2380_v40 = vld [vmem:[%s2805_s28 + $0xf9] sm:$0xff] }
 0x169   : > { %v735_v59 = vpop.permute.xlu0 %734  ;;  %v926_v60 = vpop.permute.xlu1 %925 }
 0x16a   : > { %822 = vst.msk [vmem:[#allocation2 + $0x48] sm:$0xff] %vm812_vm3, %v735_v59 }
 0x16b   : > { %1014 = vst.msk [vmem:[#allocation2 + $0x40] sm:$0xff] %vm1005_vm4, %v926_v60  ;;  %1330 = vrot.lane.b32.xlu0 %v2971_v39, %s2726_s24 }
 0x16c   : > { %1521 = vrot.lane.b32.xlu1 %v2379_v32, %s2727_s30 }
 0x16d   : > { %v1504_v61 = vpop.permute.xlu0 %1503  ;;  %v1695_v16 = vpop.permute.xlu1 %1694 }
 0x16e   : > { %1593 = vst.msk [vmem:[#allocation2 + $0x38] sm:$0xff] %vm1585_vm7, %v1504_v61 }
 0x16f   : > { %1785 = vst.msk [vmem:[#allocation2 + $0x30] sm:$0xff] %vm1778_vm8, %v1695_v16  ;;  %754 = vrot.lane.b32.xlu0 %v2971_v39, %s2723_s4  ;;  %v2412_v39 = vld [vmem:[%s2805_s28 + $0xfa] sm:$0xff] }
 0x170   : > { %945 = vrot.lane.b32.xlu1 %v2379_v32, %s2724_s5  ;;  %v2417_v32 = vld [vmem:[%s2805_s28 + $0x13a] sm:$0xff] }
 0x171   : > { %v928_v20 = vpop.permute.xlu0 %927  ;;  %v1119_v62 = vpop.permute.xlu1 %1118 }
 0x172   : > { %1015 = vst.msk [vmem:[#allocation2 + $0x48] sm:$0xff] %vm1005_vm4, %v928_v20 }
 0x173   : > { %1207 = vst.msk [vmem:[#allocation2 + $0x40] sm:$0xff] %vm1198_vm5, %v1119_v62  ;;  %1523 = vrot.lane.b32.xlu0 %v2380_v40, %s2727_s30 }
 0x174   : > { %1714 = vrot.lane.b32.xlu1 %v2411_v29, %s2728_s11 }
 0x175   : > { %v1697_v15 = vpop.permute.xlu0 %1696  ;;  %v1121_v49 = vpop.permute.xlu1 %1120 }
 0x176   : > { %v1817_v48 = vld [vmem:[#allocation2 + $0x30] sm:$0xff]  ;;  %1786 = vst.msk [vmem:[#allocation2 + $0x38] sm:$0xff] %vm1778_vm8, %v1697_v15 }
 0x177   : > { %1208 = vst.msk [vmem:[#allocation2 + $0x48] sm:$0xff] %vm1198_vm5, %v1121_v49  ;;  %2520 = vmatprep.mubr.f32.mxu0 %v1817_v48  ;;  %947 = vrot.lane.b32.xlu0 %v2380_v40, %s2724_s5  ;;  %v2355_v15 = vld [vmem:[%s2805_s28 + $0x150] sm:$0xff] }
 0x178   : > { %1138 = vrot.lane.b32.xlu1 %v2411_v29, %s2725_s10  ;;  %v2418_v29 = vld [vmem:[%s2805_s28 + $0x142] sm:$0xff] }
 0x179   : > { %v1313_v63 = vpop.permute.xlu0 %1312  ;;  %v737_v0 = vpop.permute.xlu1 %736 }
 0x17a   : > { %1401 = vst.msk [vmem:[#allocation2 + $0x40] sm:$0xff] %vm1392_vm6, %v1313_v63  ;;  %v2356_v63 = vld [vmem:[%s2805_s28 + $0x158] sm:$0xff] }
 0x17b   : > { %823 = vst.msk [vmem:[#allocation2 + $0x50] sm:$0xff] %vm812_vm3, %v737_v0  ;;  %1716 = vrot.lane.b32.xlu0 %v2412_v39, %s2728_s11  ;;  %v2387_v0 = vld [vmem:[%s2805_s28 + $0x151] sm:$0xff] }
 0x17c   : > { %1140 = vrot.lane.b32.xlu1 %v2412_v39, %s2725_s10 }
 0x17d   : > { %v1315_v34 = vpop.permute.xlu0 %1314  ;;  %v1506_v6 = vpop.permute.xlu1 %1505  ;;  %v1818_v2 = vld [vmem:[#allocation2 + $0x38] sm:$0xff] }
 0x17e   : > { %1402 = vst.msk [vmem:[#allocation2 + $0x48] sm:$0xff] %vm1392_vm6, %v1315_v34  ;;  %2521 = vmatmul.mubr.f32.gmra.mrb[6].mxu0 %v1818_v2 }
 0x17f   : > { %1594 = vst.msk [vmem:[#allocation2 + $0x40] sm:$0xff] %vm1585_vm7, %v1506_v6  ;;  %1332 = vrot.lane.b32.xlu0 %v2986_v42, %s2726_s24 }
 0x180   : > { %756 = vrot.lane.b32.xlu1 %v2986_v42, %s2723_s4  ;;  %v2382_v42 = vld [vmem:[%s2805_s28 + $0x111] sm:$0xff] }
 0x181   : > { %v739_v5 = vpop.permute.xlu0 %738  ;;  %v930_v33 = vpop.permute.xlu1 %929 }
 0x182   : > { %824 = vst.msk [vmem:[#allocation2 + $0x58] sm:$0xff] %vm812_vm3, %v739_v5  ;;  %v2388_v5 = vld [vmem:[%s2805_s28 + $0x159] sm:$0xff] }
 0x183   : > { %1016 = vst.msk [vmem:[#allocation2 + $0x50] sm:$0xff] %vm1005_vm4, %v930_v33  ;;  %1334 = vrot.lane.b32.xlu0 %v2983_v41, %s2726_s24  ;;  %v2419_v33 = vld [vmem:[%s2805_s28 + $0x152] sm:$0xff] }
 0x184   : > { %1525 = vrot.lane.b32.xlu1 %v2381_v22, %s2727_s30 }
 0x185   : > { %v1508_v13 = vpop.permute.xlu0 %1507  ;;  %v1699_v30 = vpop.permute.xlu1 %1698 }
 0x186   : > { %1595 = vst.msk [vmem:[#allocation2 + $0x48] sm:$0xff] %vm1585_vm7, %v1508_v13 }
 0x187   : > { %1787 = vst.msk [vmem:[#allocation2 + $0x40] sm:$0xff] %vm1778_vm8, %v1699_v30  ;;  %758 = vrot.lane.b32.xlu0 %v2983_v41, %s2723_s4  ;;  %v2414_v41 = vld [vmem:[%s2805_s28 + $0x112] sm:$0xff] }
 0x188   : > { %949 = vrot.lane.b32.xlu1 %v2381_v22, %s2724_s5 }
 0x189   : > { %v932_v51 = vpop.permute.xlu0 %931  ;;  %v1123_v24 = vpop.permute.xlu1 %1122 }
 0x18a   : > { %1017 = vst.msk [vmem:[#allocation2 + $0x58] sm:$0xff] %vm1005_vm4, %v932_v51 }
 0x18b   : > { %1209 = vst.msk [vmem:[#allocation2 + $0x50] sm:$0xff] %vm1198_vm5, %v1123_v24  ;;  %1527 = vrot.lane.b32.xlu0 %v2382_v42, %s2727_s30  ;;  %v2420_v24 = vld [vmem:[%s2805_s28 + $0x15a] sm:$0xff] }
 0x18c   : > { %1718 = vrot.lane.b32.xlu1 %v2413_v17, %s2728_s11 }
 0x18d   : > { %v1701_v19 = vpop.permute.xlu0 %1700  ;;  %v1125_v23 = vpop.permute.xlu1 %1124 }
 0x18e   : > { %v1819_v50 = vld [vmem:[#allocation2 + $0x40] sm:$0xff]  ;;  %1788 = vst.msk [vmem:[#allocation2 + $0x48] sm:$0xff] %vm1778_vm8, %v1701_v19 }
 0x18f   : > { %1210 = vst.msk [vmem:[#allocation2 + $0x58] sm:$0xff] %vm1198_vm5, %v1125_v23  ;;  %2523 = vmatprep.mubr.f32.mxu0 %v1819_v50  ;;  %951 = vrot.lane.b32.xlu0 %v2382_v42, %s2724_s5  ;;  %v2357_v50 = vld [vmem:[%s2805_s28 + $0x168] sm:$0xff] }
 0x190   : > { %1142 = vrot.lane.b32.xlu1 %v2413_v17, %s2725_s10 }
 0x191   : > { %v1317_v4 = vpop.permute.xlu0 %1316  ;;  %v741_v8 = vpop.permute.xlu1 %740 }
 0x192   : > { %1403 = vst.msk [vmem:[#allocation2 + $0x50] sm:$0xff] %vm1392_vm6, %v1317_v4 }
 0x193   : > { %825 = vst.msk [vmem:[#allocation2 + $0x60] sm:$0xff] %vm812_vm3, %v741_v8  ;;  %1720 = vrot.lane.b32.xlu0 %v2414_v41, %s2728_s11 }
 0x194   : > { %1144 = vrot.lane.b32.xlu1 %v2414_v41, %s2725_s10 }
 0x195   : > { %v1319_v1 = vpop.permute.xlu0 %1318  ;;  %v1510_v7 = vpop.permute.xlu1 %1509  ;;  %v1820_v52 = vld [vmem:[#allocation2 + $0x48] sm:$0xff] }
 0x196   : > { %1404 = vst.msk [vmem:[#allocation2 + $0x58] sm:$0xff] %vm1392_vm6, %v1319_v1  ;;  %2524 = vmatmul.mubr.f32.gmra.mrb[8].mxu0 %v1820_v52  ;;  %v2389_v1 = vld [vmem:[%s2805_s28 + $0x169] sm:$0xff] }
 0x197   : > { %1596 = vst.msk [vmem:[#allocation2 + $0x50] sm:$0xff] %vm1585_vm7, %v1510_v7  ;;  %1336 = vrot.lane.b32.xlu0 %v2351_v36, %s2726_s24 }
 0x198   : > { %760 = vrot.lane.b32.xlu1 %v2351_v36, %s2723_s4  ;;  %v2358_v36 = vld [vmem:[%s2805_s28 + $0x170] sm:$0xff] }
 0x199   : > { %v743_v35 = vpop.permute.xlu0 %742  ;;  %v934_v26 = vpop.permute.xlu1 %933 }
 0x19a   : > { %826 = vst.msk [vmem:[#allocation2 + $0x68] sm:$0xff] %vm812_vm3, %v743_v35  ;;  %v2390_v35 = vld [vmem:[%s2805_s28 + $0x171] sm:$0xff] }
 0x19b   : > { %1018 = vst.msk [vmem:[#allocation2 + $0x60] sm:$0xff] %vm1005_vm4, %v934_v26  ;;  %1338 = vrot.lane.b32.xlu0 %v2352_v43, %s2726_s24  ;;  %v2421_v26 = vld [vmem:[%s2805_s28 + $0x16a] sm:$0xff] }
 0x19c   : > { %1529 = vrot.lane.b32.xlu1 %v2383_v53, %s2727_s30 }
 0x19d   : > { %v1512_v31 = vpop.permute.xlu0 %1511  ;;  %v1703_v25 = vpop.permute.xlu1 %1702 }
 0x19e   : > { %1597 = vst.msk [vmem:[#allocation2 + $0x58] sm:$0xff] %vm1585_vm7, %v1512_v31 }
 0x19f   : > { %1789 = vst.msk [vmem:[#allocation2 + $0x50] sm:$0xff] %vm1778_vm8, %v1703_v25  ;;  %762 = vrot.lane.b32.xlu0 %v2352_v43, %s2723_s4 }
 0x1a0   : > { %953 = vrot.lane.b32.xlu1 %v2383_v53, %s2724_s5 }
 0x1a1   : > { %v936_v55 = vpop.permute.xlu0 %935  ;;  %v1127_v9 = vpop.permute.xlu1 %1126 }
 0x1a2   : > { %1019 = vst.msk [vmem:[#allocation2 + $0x68] sm:$0xff] %vm1005_vm4, %v936_v55 }
 0x1a3   : > { %1211 = vst.msk [vmem:[#allocation2 + $0x60] sm:$0xff] %vm1198_vm5, %v1127_v9  ;;  %1531 = vrot.lane.b32.xlu0 %v2384_v54, %s2727_s30  ;;  %v2422_v9 = vld [vmem:[%s2805_s28 + $0x172] sm:$0xff] }
 0x1a4   : > { %1722 = vrot.lane.b32.xlu1 %v2415_v10, %s2728_s11 }
 0x1a5   : > { %v1705_v3 = vpop.permute.xlu0 %1704  ;;  %v1129_v45 = vpop.permute.xlu1 %1128 }
 0x1a6   : > { %v1821_v18 = vld [vmem:[#allocation2 + $0x50] sm:$0xff]  ;;  %1790 = vst.msk [vmem:[#allocation2 + $0x58] sm:$0xff] %vm1778_vm8, %v1705_v3 }
 0x1a7   : > { %1212 = vst.msk [vmem:[#allocation2 + $0x68] sm:$0xff] %vm1198_vm5, %v1129_v45  ;;  %2526 = vmatprep.mubr.f32.mxu0 %v1821_v18  ;;  %955 = vrot.lane.b32.xlu0 %v2384_v54, %s2724_s5  ;;  %v2359_v18 = vld [vmem:[%s2805_s28 + $0x180] sm:$0xff] }
 0x1a8   : > { %1146 = vrot.lane.b32.xlu1 %v2415_v10, %s2725_s10 }
 0x1a9   : > { %v1321_v38 = vpop.permute.xlu0 %1320  ;;  %v745_v44 = vpop.permute.xlu1 %744 }
 0x1aa   : > { %1405 = vst.msk [vmem:[#allocation2 + $0x60] sm:$0xff] %vm1392_vm6, %v1321_v38 }
 0x1ab   : > { %827 = vst.msk [vmem:[#allocation2 + $0x70] sm:$0xff] %vm812_vm3, %v745_v44  ;;  %1724 = vrot.lane.b32.xlu0 %v2416_v28, %s2728_s11 }
 0x1ac   : > { %1148 = vrot.lane.b32.xlu1 %v2416_v28, %s2725_s10 }
 0x1ad   : > { %v1323_v57 = vpop.permute.xlu0 %1322  ;;  %v1822_v27 = vld [vmem:[#allocation2 + $0x58] sm:$0xff] }
 0x1ae   : > { %v1514_v12 = vpop.permute.xlu1 %1513  ;;  %1406 = vst.msk [vmem:[#allocation2 + $0x68] sm:$0xff] %vm1392_vm6, %v1323_v57  ;;  %2527 = vmatmul.mubr.f32.gmra.mrb[10].mxu0 %v1822_v27  ;;  %v2391_v57 = vld [vmem:[%s2805_s28 + $0x181] sm:$0xff] }
 0x1af   : > { %1598 = vst.msk [vmem:[#allocation2 + $0x60] sm:$0xff] %vm1585_vm7, %v1514_v12  ;;  %1340 = vrot.lane.b32.xlu0 %v2353_v56, %s2726_s24 }
 0x1b0   : > { %764 = vrot.lane.b32.xlu1 %v2353_v56, %s2723_s4  ;;  %v2360_v56 = vld [vmem:[%s2805_s28 + $0x188] sm:$0xff] }
 0x1b1   : > { %v747_v21 = vpop.permute.xlu0 %746 }
 0x1b2   : > { %v938_v11 = vpop.permute.xlu1 %937  ;;  %828 = vst.msk [vmem:[#allocation2 + $0x78] sm:$0xff] %vm812_vm3, %v747_v21  ;;  %v2392_v21 = vld [vmem:[%s2805_s28 + $0x189] sm:$0xff] }
 0x1b3   : > { %1020 = vst.msk [vmem:[#allocation2 + $0x70] sm:$0xff] %vm1005_vm4, %v938_v11  ;;  %1342 = vrot.lane.b32.xlu0 %v2354_v37, %s2726_s24  ;;  %v2423_v11 = vld [vmem:[%s2805_s28 + $0x182] sm:$0xff] }
 0x1b4   : > { %1533 = vrot.lane.b32.xlu1 %v2385_v58, %s2727_s30 }
 0x1b5   : > { %v1516_v47 = vpop.permute.xlu0 %1515 }
 0x1b6   : > { %v1707_v46 = vpop.permute.xlu1 %1706  ;;  %1599 = vst.msk [vmem:[#allocation2 + $0x68] sm:$0xff] %vm1585_vm7, %v1516_v47 }
 0x1b7   : > { %1791 = vst.msk [vmem:[#allocation2 + $0x60] sm:$0xff] %vm1778_vm8, %v1707_v46  ;;  %766 = vrot.lane.b32.xlu0 %v2354_v37, %s2723_s4 }
 0x1b8   : > { %957 = vrot.lane.b32.xlu1 %v2385_v58, %s2724_s5 }
 0x1b9   : > { %v940_v59 = vpop.permute.xlu0 %939 }
 0x1ba   : > { %v1131_v60 = vpop.permute.xlu1 %1130  ;;  %1021 = vst.msk [vmem:[#allocation2 + $0x78] sm:$0xff] %vm1005_vm4, %v940_v59 }
 0x1bb   : > { %1213 = vst.msk [vmem:[#allocation2 + $0x70] sm:$0xff] %vm1198_vm5, %v1131_v60  ;;  %1535 = vrot.lane.b32.xlu0 %v2386_v14, %s2727_s30  ;;  %v2424_v60 = vld [vmem:[%s2805_s28 + $0x18a] sm:$0xff] }
 0x1bc   : > { %1726 = vrot.lane.b32.xlu1 %v2417_v32, %s2728_s11 }
 0x1bd   : > { %v1709_v61 = vpop.permute.xlu0 %1708 }
 0x1be   : > { %v1133_v16 = vpop.permute.xlu1 %1132  ;;  %v1823_v40 = vld [vmem:[#allocation2 + $0x60] sm:$0xff]  ;;  %1792 = vst.msk [vmem:[#allocation2 + $0x68] sm:$0xff] %vm1778_vm8, %v1709_v61 }
 0x1bf   : > { %1214 = vst.msk [vmem:[#allocation2 + $0x78] sm:$0xff] %vm1198_vm5, %v1133_v16  ;;  %2529 = vmatprep.mubr.f32.mxu0 %v1823_v40  ;;  %959 = vrot.lane.b32.xlu0 %v2386_v14, %s2724_s5  ;;  %v2361_v40 = vld [vmem:[%s2805_s28 + $0x198] sm:$0xff] }
 0x1c0   : > { %1150 = vrot.lane.b32.xlu1 %v2417_v32, %s2725_s10 }
 0x1c1   : > { %v1325_v20 = vpop.permute.xlu0 %1324 }
 0x1c2   : > { %v749_v62 = vpop.permute.xlu1 %748  ;;  %1407 = vst.msk [vmem:[#allocation2 + $0x70] sm:$0xff] %vm1392_vm6, %v1325_v20 }
 0x1c3   : > { %829 = vst.msk [vmem:[#allocation2 + $0x80] sm:$0xff] %vm812_vm3, %v749_v62  ;;  %1728 = vrot.lane.b32.xlu0 %v2418_v29, %s2728_s11 }
 0x1c4   : > { %1152 = vrot.lane.b32.xlu1 %v2418_v29, %s2725_s10  ;;  %v2362_v29 = vld [vmem:[%s2805_s28 + $0x1a0] sm:$0xff] }
 0x1c5   : > { %v1327_v49 = vpop.permute.xlu0 %1326  ;;  %v1824_v39 = vld [vmem:[#allocation2 + $0x68] sm:$0xff] }
 0x1c6   : > { %v1518_v48 = vpop.permute.xlu1 %1517  ;;  %1408 = vst.msk [vmem:[#allocation2 + $0x78] sm:$0xff] %vm1392_vm6, %v1327_v49  ;;  %2530 = vmatmul.mubr.f32.gmra.mrb[12].mxu0 %v1824_v39  ;;  %v3720_v49 = vld [vmem:[%s3873_s2] ss:$0 sm:$0xff]  ;;  %v2394_v39 = vld [vmem:[%s2805_s28 + $0x1a1] sm:$0xff] }
 0x1c7   : > { %1600 = vst.msk [vmem:[#allocation2 + $0x70] sm:$0xff] %vm1585_vm7, %v1518_v48  ;;  %1344 = vrot.lane.b32.xlu0 %v2355_v15, %s2726_s24  ;;  %v2393_v48 = vld [vmem:[%s2805_s28 + $0x199] sm:$0xff] }
 0x1c8   : > { %768 = vrot.lane.b32.xlu1 %v2355_v15, %s2723_s4 }
 0x1c9   : > { %v751_v34 = vpop.permute.xlu0 %750 }
 0x1ca   : > { %v942_v6 = vpop.permute.xlu1 %941  ;;  %830 = vst.msk [vmem:[#allocation2 + $0x88] sm:$0xff] %vm812_vm3, %v751_v34 }
 0x1cb   : > { %1022 = vst.msk [vmem:[#allocation2 + $0x80] sm:$0xff] %vm1005_vm4, %v942_v6  ;;  %1346 = vrot.lane.b32.xlu0 %v2356_v63, %s2726_s24 }
 0x1cc   : > { %1537 = vrot.lane.b32.xlu1 %v2387_v0, %s2727_s30 }
 0x1cd   : > { %v1520_v2 = vpop.permute.xlu0 %1519 }
 0x1ce   : > { %v1711_v22 = vpop.permute.xlu1 %1710  ;;  %1601 = vst.msk [vmem:[#allocation2 + $0x78] sm:$0xff] %vm1585_vm7, %v1520_v2 }
 0x1cf   : > { %1793 = vst.msk [vmem:[#allocation2 + $0x70] sm:$0xff] %vm1778_vm8, %v1711_v22  ;;  %770 = vrot.lane.b32.xlu0 %v2356_v63, %s2723_s4 }
 0x1d0   : > { %961 = vrot.lane.b32.xlu1 %v2387_v0, %s2724_s5 }
 0x1d1   : > { %v944_v13 = vpop.permute.xlu0 %943 }
 0x1d2   : > { %v1135_v30 = vpop.permute.xlu1 %1134  ;;  %1023 = vst.msk [vmem:[#allocation2 + $0x88] sm:$0xff] %vm1005_vm4, %v944_v13  ;;  %v2426_v13 = vld [vmem:[%s2805_s28 + $0x1a2] sm:$0xff] }
 0x1d3   : > { %1215 = vst.msk [vmem:[#allocation2 + $0x80] sm:$0xff] %vm1198_vm5, %v1135_v30  ;;  %1539 = vrot.lane.b32.xlu0 %v2388_v5, %s2727_s30 }
 0x1d4   : > { %1730 = vrot.lane.b32.xlu1 %v2419_v33, %s2728_s11 }
 0x1d5   : > { %v1713_v42 = vpop.permute.xlu0 %1712 }
 0x1d6   : > { %v1137_v17 = vpop.permute.xlu1 %1136  ;;  %v1825_v51 = vld [vmem:[#allocation2 + $0x70] sm:$0xff]  ;;  %1794 = vst.msk [vmem:[#allocation2 + $0x78] sm:$0xff] %vm1778_vm8, %v1713_v42 }
 0x1d7   : > { %1216 = vst.msk [vmem:[#allocation2 + $0x88] sm:$0xff] %vm1198_vm5, %v1137_v17  ;;  %2532 = vmatprep.mubr.f32.mxu0 %v1825_v51  ;;  %963 = vrot.lane.b32.xlu0 %v2388_v5, %s2724_s5 }
 0x1d8   : > { %1154 = vrot.lane.b32.xlu1 %v2419_v33, %s2725_s10  ;;  %v2425_v33 = vld [vmem:[%s2805_s28 + $0x19a] sm:$0xff]  ;;  %s161_s28 = sand.u32 1, %s2710_s13  }
 0x1d9   : > { %v1329_v19 = vpop.permute.xlu0 %1328  ;;  %s162_s17 = scalar_lea.vmem [#allocation3], %s161_s28  ;;  %s2163_s26 = scalar_lea.sflag [#allocation4], %s161_s28 }
 0x1da   : > { %v753_v23 = vpop.permute.xlu1 %752  ;;  %1409 = vst.msk [vmem:[#allocation2 + $0x80] sm:$0xff] %vm1392_vm6, %v1329_v19  ;;  %s2175_s19 = sshll.u32 %s162_s17, 4  ;;  %s3831_s19 = int_to_ptr.vmem [resolvable:$true] %s2175_s19 }
 0x1db   : > { %831 = vst.msk [vmem:[#allocation2 + $0x90] sm:$0xff] %vm812_vm3, %v753_v23  ;;  %1732 = vrot.lane.b32.xlu0 %v2420_v24, %s2728_s11  ;;  %s2656_s27 = scalar_lea.vmem %s3831_s19, 16 }
 0x1dc   : > { %1156 = vrot.lane.b32.xlu1 %v2420_v24, %s2725_s10  ;;  %p2657_p11 = scmp.ne.s32.totalorder %s3831_s19, %s2656_s27 }
 0x1dd   : > { %v1331_v41 = vpop.permute.xlu0 %1330  ;;  %v1826_v8 = vld [vmem:[#allocation2 + $0x78] sm:$0xff] }
 0x1de   : > { %v1522_v4 = vpop.permute.xlu1 %1521  ;;  %1410 = vst.msk [vmem:[#allocation2 + $0x88] sm:$0xff] %vm1392_vm6, %v1331_v41  ;;  %2533 = vmatmul.mubr.f32.gmra.mrb[14].mxu0 %v1826_v8  ;;  %p2658_p12 = pnand %p2657_p11, %p2788_p5 }
 0x1df   : > { %1602 = vst.msk [vmem:[#allocation2 + $0x80] sm:$0xff] %vm1585_vm7, %v1522_v4  ;;  %1348 = vrot.lane.b32.xlu0 %v2357_v50, %s2726_s24 }
 0x1e0   : > { %772 = vrot.lane.b32.xlu1 %v2357_v50, %s2723_s4  ;;  %p2659_p13 = pneg %p2658_p12 }
 0x1e1   : > { %v755_v7 = vpop.permute.xlu0 %754 }
 0x1e2   : > { %v946_v52 = vpop.permute.xlu1 %945  ;;  %832 = vst.msk [vmem:[#allocation2 + $0x98] sm:$0xff] %vm812_vm3, %v755_v7 }
 0x1e3   : > { %1024 = vst.msk [vmem:[#allocation2 + $0x90] sm:$0xff] %vm1005_vm4, %v946_v52  ;;  %1350 = vrot.lane.b32.xlu0 %v2358_v36, %s2726_s24 }
 0x1e4   : > { %1541 = vrot.lane.b32.xlu1 %v2389_v1, %s2727_s30 }
 0x1e5   : > { %v1524_v43 = vpop.permute.xlu0 %1523 }
 0x1e6   : > { %v1715_v53 = vpop.permute.xlu1 %1714  ;;  %1603 = vst.msk [vmem:[#allocation2 + $0x88] sm:$0xff] %vm1585_vm7, %v1524_v43 }
 0x1e7   : > { %1795 = vst.msk [vmem:[#allocation2 + $0x80] sm:$0xff] %vm1778_vm8, %v1715_v53  ;;  %774 = vrot.lane.b32.xlu0 %v2358_v36, %s2723_s4 }
 0x1e8   : > { %965 = vrot.lane.b32.xlu1 %v2389_v1, %s2724_s5 }
 0x1e9   : > { %v948_v31 = vpop.permute.xlu0 %947 }
 0x1ea   : > { %v1139_v25 = vpop.permute.xlu1 %1138  ;;  %1025 = vst.msk [vmem:[#allocation2 + $0x98] sm:$0xff] %vm1005_vm4, %v948_v31 }
 0x1eb   : > { %1217 = vst.msk [vmem:[#allocation2 + $0x90] sm:$0xff] %vm1198_vm5, %v1139_v25  ;;  %1543 = vrot.lane.b32.xlu0 %v2390_v35, %s2727_s30 }
 0x1ec   : > { %1734 = vrot.lane.b32.xlu1 %v2421_v26, %s2728_s11 }
 0x1ed   : > { %v1717_v54 = vpop.permute.xlu0 %1716 }
 0x1ee   : > { %v1141_v10 = vpop.permute.xlu1 %1140  ;;  %v1827_v55 = vld [vmem:[#allocation2 + $0x80] sm:$0xff]  ;;  %1796 = vst.msk [vmem:[#allocation2 + $0x88] sm:$0xff] %vm1778_vm8, %v1717_v54 }
 0x1ef   : > { %1218 = vst.msk [vmem:[#allocation2 + $0x98] sm:$0xff] %vm1198_vm5, %v1141_v10  ;;  %2535 = vmatprep.mubr.f32.mxu1 %v1827_v55  ;;  %967 = vrot.lane.b32.xlu0 %v2390_v35, %s2724_s5 }
 0x1f0   : > { %1158 = vrot.lane.b32.xlu1 %v2421_v26, %s2725_s10 }
 0x1f1   : > { %v1333_v3 = vpop.permute.xlu0 %1332 }
 0x1f2   : > { %v757_v45 = vpop.permute.xlu1 %756  ;;  %1411 = vst.msk [vmem:[#allocation2 + $0x90] sm:$0xff] %vm1392_vm6, %v1333_v3 }
 0x1f3   : > { %833 = vst.msk [vmem:[#allocation2 + $0xa0] sm:$0xff] %vm812_vm3, %v757_v45  ;;  %1736 = vrot.lane.b32.xlu0 %v2422_v9, %s2728_s11 }
 0x1f4   : > { %1160 = vrot.lane.b32.xlu1 %v2422_v9, %s2725_s10 }
 0x1f5   : > { %v1335_v28 = vpop.permute.xlu0 %1334  ;;  %v1828_v44 = vld [vmem:[#allocation2 + $0x88] sm:$0xff] }
 0x1f6   : > { %v1526_v38 = vpop.permute.xlu1 %1525  ;;  %1412 = vst.msk [vmem:[#allocation2 + $0x98] sm:$0xff] %vm1392_vm6, %v1335_v28  ;;  %2536 = vmatmul.mubr.f32.vlgmr.msra.gmra.mrb[0].mxu1 %v1828_v44 }
 0x1f7   : > { %1604 = vst.msk [vmem:[#allocation2 + $0x90] sm:$0xff] %vm1585_vm7, %v1526_v38  ;;  %1352 = vrot.lane.b32.xlu0 %v2359_v18, %s2726_s24 }
 0x1f8   : > { %776 = vrot.lane.b32.xlu1 %v2359_v18, %s2723_s4 }
 0x1f9   : > { %v759_v12 = vpop.permute.xlu0 %758 }
 0x1fa   : > { %v950_v27 = vpop.permute.xlu1 %949  ;;  %834 = vst.msk [vmem:[#allocation2 + $0xa8] sm:$0xff] %vm812_vm3, %v759_v12 }
 0x1fb   : > { %1026 = vst.msk [vmem:[#allocation2 + $0xa0] sm:$0xff] %vm1005_vm4, %v950_v27  ;;  %1354 = vrot.lane.b32.xlu0 %v2360_v56, %s2726_s24 }
 0x1fc   : > { %1545 = vrot.lane.b32.xlu1 %v2391_v57, %s2727_s30 }
 0x1fd   : > { %v1528_v37 = vpop.permute.xlu0 %1527 }
 0x1fe   : > { %v1719_v58 = vpop.permute.xlu1 %1718  ;;  %1605 = vst.msk [vmem:[#allocation2 + $0x98] sm:$0xff] %vm1585_vm7, %v1528_v37 }
 0x1ff   : > { %1797 = vst.msk [vmem:[#allocation2 + $0x90] sm:$0xff] %vm1778_vm8, %v1719_v58  ;;  %778 = vrot.lane.b32.xlu0 %v2360_v56, %s2723_s4 }
 0x200   : > { %969 = vrot.lane.b32.xlu1 %v2391_v57, %s2724_s5 }
 0x201   : > { %v952_v47 = vpop.permute.xlu0 %951 }
 0x202   : > { %v1143_v46 = vpop.permute.xlu1 %1142  ;;  %1027 = vst.msk [vmem:[#allocation2 + $0xa8] sm:$0xff] %vm1005_vm4, %v952_v47 }
 0x203   : > { %1219 = vst.msk [vmem:[#allocation2 + $0xa0] sm:$0xff] %vm1198_vm5, %v1143_v46  ;;  %1547 = vrot.lane.b32.xlu0 %v2392_v21, %s2727_s30 }
 0x204   : > { %1738 = vrot.lane.b32.xlu1 %v2423_v11, %s2728_s11 }
 0x205   : > { %v1721_v14 = vpop.permute.xlu0 %1720 }
 0x206   : > { %v1145_v32 = vpop.permute.xlu1 %1144  ;;  %v1829_v59 = vld [vmem:[#allocation2 + $0x90] sm:$0xff]  ;;  %1798 = vst.msk [vmem:[#allocation2 + $0x98] sm:$0xff] %vm1778_vm8, %v1721_v14 }
 0x207   : > { %1220 = vst.msk [vmem:[#allocation2 + $0xa8] sm:$0xff] %vm1198_vm5, %v1145_v32  ;;  %2538 = vmatprep.mubr.f32.mxu1 %v1829_v59  ;;  %971 = vrot.lane.b32.xlu0 %v2392_v21, %s2724_s5 }
 0x208   : > { %1162 = vrot.lane.b32.xlu1 %v2423_v11, %s2725_s10 }
 0x209   : > { %v1337_v61 = vpop.permute.xlu0 %1336 }
 0x20a   : > { %v761_v16 = vpop.permute.xlu1 %760  ;;  %1413 = vst.msk [vmem:[#allocation2 + $0xa0] sm:$0xff] %vm1392_vm6, %v1337_v61 }
 0x20b   : > { %835 = vst.msk [vmem:[#allocation2 + $0xb0] sm:$0xff] %vm812_vm3, %v761_v16  ;;  %1740 = vrot.lane.b32.xlu0 %v2424_v60, %s2728_s11 }
 0x20c   : > { %1164 = vrot.lane.b32.xlu1 %v2424_v60, %s2725_s10  ;;  %s2428_s10 = sshll.u32 %s2771_s16, 4  ;;  %s2729_s16 = smov [#allocation3]  }
 0x20d   : > { %v1339_v20 = vpop.permute.xlu0 %1338  ;;  %v1830_v15 = vld [vmem:[#allocation2 + $0x98] sm:$0xff]  ;;  %s3829_s25 = scalar_lea.hbm %s3874_s3, %s2428_s10  ;;  %s2660_s29 = sshll.u32 %s2729_s16, 4  ;;  %s2661_s29 = int_to_ptr.vmem [resolvable:$false] %s2660_s29 }
 0x20e   : > { %v1530_v62 = vpop.permute.xlu1 %1529  ;;  %1414 = vst.msk [vmem:[#allocation2 + $0xa8] sm:$0xff] %vm1392_vm6, %v1339_v20  ;;  %2539 = vmatmul.mubr.f32.gmra.mrb[2].mxu1 %v1830_v15  ;;  %p2663_p0 = scmp.lt.s32.totalorder %s3831_s19, %s2661_s29 }
 0x20f   : > { %1606 = vst.msk [vmem:[#allocation2 + $0xa0] sm:$0xff] %vm1585_vm7, %v1530_v62  ;;  %1356 = vrot.lane.b32.xlu0 %v2361_v40, %s2726_s24 }
 0x210   : > { %1358 = vrot.lane.b32.xlu1 %v2362_v29, %s2726_s24 }
 0x211   : > { %v763_v63 = vpop.permute.xlu0 %762  ;;  %v2513_v0 = vpop.f32.mrb[0].mxu0 }
 0x212   : > { %836 = vst.msk [vmem:[#allocation2 + $0xb8] sm:$0xff] %vm812_vm3, %v763_v63  ;;  %v1938_v34 = vadd.f32 %v2513_v0, %v3720_v49  ;;  %v954_v6 = vpop.permute.xlu1 %953  ;;  %v1932_v2 = vpop.f32.mrb[1].mxu0 }
 0x213   : > { %1028 = vst.msk [vmem:[#allocation2 + $0xb0] sm:$0xff] %vm1005_vm4, %v954_v6  ;;  %v1933_v22 = vadd.f32 %v3720_v49, %v1932_v2  ;;  %1549 = vrot.lane.b32.xlu0 %v2393_v48, %s2727_s30 }
 0x214   : > { %1551 = vrot.lane.b32.xlu1 %v2394_v39, %s2727_s30  ;;  %v2092_v5 = vmax.f32 %v1938_v34, 0.0  ;;  %s2662_s30 = scalar_lea.vmem %s2661_s29, 32 }
 0x215   : > { %v2091_v30 = vmax.f32 %v1933_v22, 0.0  ;;  %v1532_v42 = vpop.permute.xlu0 %1531  ;;  %p2664_p1 = scmp.lt.s32.totalorder %s2662_s30, %s2656_s27 }
 0x216   : > { %1607 = vst.msk [vmem:[#allocation2 + $0xa8] sm:$0xff] %vm1585_vm7, %v1532_v42  ;;  %v1723_v17 = vpop.permute.xlu1 %1722 }
 0x217   : > { %v2123_v51 = vadd.f32 %v2092_v5, %v2091_v30  ;;  %1799 = vst.msk [vmem:[#allocation2 + $0xa0] sm:$0xff] %vm1778_vm8, %v1723_v17  ;;  %1742 = vrot.lane.b32.xlu0 %v2425_v33, %s2728_s11  ;;  %p2665_p2 = por %p2664_p1, %p2663_p0 }
 0x218   : > { %1744 = vrot.lane.b32.xlu1 %v2426_v13, %s2728_s11 }
 0x219   : > { %v956_v24 = vpop.permute.xlu0 %955  ;;  %p2666_p3 = pnand %p2665_p2, %p2659_p13 }
 0x21a   : > { %1029 = vst.msk [vmem:[#allocation2 + $0xb8] sm:$0xff] %vm1005_vm4, %v956_v24  ;;  %v1147_v19 = vpop.permute.xlu1 %1146 }
 0x21b   : > { %1221 = vst.msk [vmem:[#allocation2 + $0xb0] sm:$0xff] %vm1198_vm5, %v1147_v19 }
 0x21d   : > { %v1725_v23 = vpop.permute.xlu0 %1724 }
 0x21e   : > { %1800 = vst.msk [vmem:[#allocation2 + $0xa8] sm:$0xff] %vm1778_vm8, %v1725_v23  ;;  %v1149_v50 = vpop.permute.xlu1 %1148  ;;  %v1831_v41 = vld [vmem:[#allocation2 + $0xa0] sm:$0xff] }
 0x21f   : > { %1222 = vst.msk [vmem:[#allocation2 + $0xb8] sm:$0xff] %vm1198_vm5, %v1149_v50  ;;  %2541 = vmatprep.mubr.f32.mxu1 %v1831_v41 }
 0x221   : > { %v1341_v4 = vpop.permute.xlu0 %1340 }
 0x222   : > { %1415 = vst.msk [vmem:[#allocation2 + $0xb0] sm:$0xff] %vm1392_vm6, %v1341_v4  ;;  %v765_v8 = vpop.permute.xlu1 %764 }
 0x223   : > { %837 = vst.msk [vmem:[#allocation2 + $0xc0] sm:$0xff] %vm812_vm3, %v765_v8 }
 0x225   : > { %v1343_v36 = vpop.permute.xlu0 %1342  ;;  %v2516_v1 = vpop.f32.mrb[2].mxu0  ;;  %v1832_v7 = vld [vmem:[#allocation2 + $0xa8] sm:$0xff] }
 0x226   : > { %1416 = vst.msk [vmem:[#allocation2 + $0xb8] sm:$0xff] %vm1392_vm6, %v1343_v36  ;;  %v1534_v52 = vpop.permute.xlu1 %1533  ;;  %v1942_v43 = vpop.f32.mrb[3].mxu0  ;;  %2542 = vmatmul.mubr.f32.gmra.mrb[4].mxu1 %v1832_v7  ;;  %v1948_v53 = vadd.f32 %v2516_v1, %v3720_v49 }
 0x227   : > { %1608 = vst.msk [vmem:[#allocation2 + $0xb0] sm:$0xff] %vm1585_vm7, %v1534_v52  ;;  %v1943_v35 = vadd.f32 %v3720_v49, %v1942_v43 }
 0x228   : > { %v2094_v54 = vmax.f32 %v1948_v53, 0.0 }
 0x229   : > { %v2093_v26 = vmax.f32 %v1943_v35, 0.0  ;;  %v767_v31 = vpop.permute.xlu0 %766 }
 0x22a   : > { %838 = vst.msk [vmem:[#allocation2 + $0xc8] sm:$0xff] %vm812_vm3, %v767_v31  ;;  %v958_v25 = vpop.permute.xlu1 %957 }
 0x22b   : > { %v2124_v10 = vadd.f32 %v2123_v51, %v2093_v26  ;;  %1030 = vst.msk [vmem:[#allocation2 + $0xc0] sm:$0xff] %vm1005_vm4, %v958_v25 }
 0x22d   : > { %v1536_v55 = vpop.permute.xlu0 %1535  ;;  %v2125_v9 = vadd.f32 %v2124_v10, %v2094_v54 }
 0x22e   : > { %1609 = vst.msk [vmem:[#allocation2 + $0xb8] sm:$0xff] %vm1585_vm7, %v1536_v55  ;;  %v1727_v3 = vpop.permute.xlu1 %1726 }
 0x22f   : > { %1801 = vst.msk [vmem:[#allocation2 + $0xb0] sm:$0xff] %vm1778_vm8, %v1727_v3 }
 0x231   : > { %v960_v45 = vpop.permute.xlu0 %959 }
 0x232   : > { %1031 = vst.msk [vmem:[#allocation2 + $0xc8] sm:$0xff] %vm1005_vm4, %v960_v45  ;;  %v1151_v18 = vpop.permute.xlu1 %1150 }
 0x233   : > { %1223 = vst.msk [vmem:[#allocation2 + $0xc0] sm:$0xff] %vm1198_vm5, %v1151_v18 }
 0x235   : > { %v1729_v28 = vpop.permute.xlu0 %1728 }
 0x236   : > { %1802 = vst.msk [vmem:[#allocation2 + $0xb8] sm:$0xff] %vm1778_vm8, %v1729_v28  ;;  %v1153_v38 = vpop.permute.xlu1 %1152  ;;  %v1833_v44 = vld [vmem:[#allocation2 + $0xb0] sm:$0xff] }
 0x237   : > { %1224 = vst.msk [vmem:[#allocation2 + $0xc8] sm:$0xff] %vm1198_vm5, %v1153_v38  ;;  %2544 = vmatprep.mubr.f32.mxu1 %v1833_v44 }
 0x239   : > { %v1345_v56 = vpop.permute.xlu0 %1344  ;;  %v2519_v57 = vpop.f32.mrb[4].mxu0 }
 0x23a   : > { %1417 = vst.msk [vmem:[#allocation2 + $0xc0] sm:$0xff] %vm1392_vm6, %v1345_v56  ;;  %v769_v12 = vpop.permute.xlu1 %768  ;;  %v1952_v27 = vpop.f32.mrb[5].mxu0  ;;  %v1958_v37 = vadd.f32 %v2519_v57, %v3720_v49 }
 0x23b   : > { %839 = vst.msk [vmem:[#allocation2 + $0xd0] sm:$0xff] %vm812_vm3, %v769_v12  ;;  %v1953_v58 = vadd.f32 %v3720_v49, %v1952_v27 }
 0x23c   : > { %v2096_v14 = vmax.f32 %v1958_v37, 0.0 }
 0x23d   : > { %v2095_v21 = vmax.f32 %v1953_v58, 0.0  ;;  %v1347_v11 = vpop.permute.xlu0 %1346  ;;  %v1834_v47 = vld [vmem:[#allocation2 + $0xb8] sm:$0xff] }
 0x23e   : > { %1418 = vst.msk [vmem:[#allocation2 + $0xc8] sm:$0xff] %vm1392_vm6, %v1347_v11  ;;  %v1538_v46 = vpop.permute.xlu1 %1537  ;;  %2545 = vmatmul.mubr.f32.gmra.mrb[6].mxu1 %v1834_v47 }
 0x23f   : > { %v2126_v32 = vadd.f32 %v2125_v9, %v2095_v21  ;;  %1610 = vst.msk [vmem:[#allocation2 + $0xc0] sm:$0xff] %vm1585_vm7, %v1538_v46 }
 0x241   : > { %v771_v59 = vpop.permute.xlu0 %770  ;;  %v2127_v60 = vadd.f32 %v2126_v32, %v2096_v14 }
 0x242   : > { %840 = vst.msk [vmem:[#allocation2 + $0xd8] sm:$0xff] %vm812_vm3, %v771_v59  ;;  %v962_v61 = vpop.permute.xlu1 %961 }
 0x243   : > { %1032 = vst.msk [vmem:[#allocation2 + $0xd0] sm:$0xff] %vm1005_vm4, %v962_v61 }
 0x245   : > { %v1540_v16 = vpop.permute.xlu0 %1539 }
 0x246   : > { %1611 = vst.msk [vmem:[#allocation2 + $0xc8] sm:$0xff] %vm1585_vm7, %v1540_v16  ;;  %v1731_v40 = vpop.permute.xlu1 %1730 }
 0x247   : > { %1803 = vst.msk [vmem:[#allocation2 + $0xc0] sm:$0xff] %vm1778_vm8, %v1731_v40 }
 0x249   : > { %v964_v29 = vpop.permute.xlu0 %963 }
 0x24a   : > { %1033 = vst.msk [vmem:[#allocation2 + $0xd8] sm:$0xff] %vm1005_vm4, %v964_v29  ;;  %v1155_v20 = vpop.permute.xlu1 %1154 }
 0x24b   : > { %1225 = vst.msk [vmem:[#allocation2 + $0xd0] sm:$0xff] %vm1198_vm5, %v1155_v20 }
 0x24d   : > { %v1733_v62 = vpop.permute.xlu0 %1732 }
 0x24e   : > { %1804 = vst.msk [vmem:[#allocation2 + $0xc8] sm:$0xff] %vm1778_vm8, %v1733_v62  ;;  %v1157_v15 = vpop.permute.xlu1 %1156  ;;  %v1835_v48 = vld [vmem:[#allocation2 + $0xc0] sm:$0xff] }
 0x24f   : > { %1226 = vst.msk [vmem:[#allocation2 + $0xd8] sm:$0xff] %vm1198_vm5, %v1157_v15  ;;  %2547 = vmatprep.mubr.f32.mxu1 %v1835_v48 }
 0x251   : > { %v1349_v39 = vpop.permute.xlu0 %1348  ;;  %v2522_v63 = vpop.f32.mrb[6].mxu0 }
 0x252   : > { %1419 = vst.msk [vmem:[#allocation2 + $0xd0] sm:$0xff] %vm1392_vm6, %v1349_v39  ;;  %v773_v0 = vpop.permute.xlu1 %772  ;;  %v1962_v34 = vpop.f32.mrb[7].mxu0  ;;  %v1968_v6 = vadd.f32 %v2522_v63, %v3720_v49 }
 0x253   : > { %841 = vst.msk [vmem:[#allocation2 + $0xe0] sm:$0xff] %vm812_vm3, %v773_v0  ;;  %v1963_v2 = vadd.f32 %v3720_v49, %v1962_v34 }
 0x254   : > { %v2098_v30 = vmax.f32 %v1968_v6, 0.0 }
 0x255   : > { %v2097_v22 = vmax.f32 %v1963_v2, 0.0  ;;  %v1351_v5 = vpop.permute.xlu0 %1350  ;;  %v1836_v33 = vld [vmem:[#allocation2 + $0xc8] sm:$0xff] }
 0x256   : > { %1420 = vst.msk [vmem:[#allocation2 + $0xd8] sm:$0xff] %vm1392_vm6, %v1351_v5  ;;  %v1542_v13 = vpop.permute.xlu1 %1541  ;;  %2548 = vmatmul.mubr.f32.gmra.mrb[8].mxu1 %v1836_v33 }
 0x257   : > { %v2128_v42 = vadd.f32 %v2127_v60, %v2097_v22  ;;  %1612 = vst.msk [vmem:[#allocation2 + $0xd0] sm:$0xff] %vm1585_vm7, %v1542_v13 }
 0x259   : > { %v775_v17 = vpop.permute.xlu0 %774  ;;  %v2129_v51 = vadd.f32 %v2128_v42, %v2098_v30 }
 0x25a   : > { %842 = vst.msk [vmem:[#allocation2 + $0xe8] sm:$0xff] %vm812_vm3, %v775_v17  ;;  %v966_v24 = vpop.permute.xlu1 %965 }
 0x25b   : > { %1034 = vst.msk [vmem:[#allocation2 + $0xe0] sm:$0xff] %vm1005_vm4, %v966_v24 }
 0x25d   : > { %v1544_v19 = vpop.permute.xlu0 %1543 }
 0x25e   : > { %1613 = vst.msk [vmem:[#allocation2 + $0xd8] sm:$0xff] %vm1585_vm7, %v1544_v19  ;;  %v1735_v23 = vpop.permute.xlu1 %1734 }
 0x25f   : > { %1805 = vst.msk [vmem:[#allocation2 + $0xd0] sm:$0xff] %vm1778_vm8, %v1735_v23 }
 0x261   : > { %v968_v50 = vpop.permute.xlu0 %967 }
 0x262   : > { %1035 = vst.msk [vmem:[#allocation2 + $0xe8] sm:$0xff] %vm1005_vm4, %v968_v50  ;;  %v1159_v41 = vpop.permute.xlu1 %1158 }
 0x263   : > { %1227 = vst.msk [vmem:[#allocation2 + $0xe0] sm:$0xff] %vm1198_vm5, %v1159_v41 }
 0x265   : > { %v1737_v4 = vpop.permute.xlu0 %1736 }
 0x266   : > { %1806 = vst.msk [vmem:[#allocation2 + $0xd8] sm:$0xff] %vm1778_vm8, %v1737_v4  ;;  %v1161_v8 = vpop.permute.xlu1 %1160  ;;  %v1837_v36 = vld [vmem:[#allocation2 + $0xd0] sm:$0xff] }
 0x267   : > { %1228 = vst.msk [vmem:[#allocation2 + $0xe8] sm:$0xff] %vm1198_vm5, %v1161_v8  ;;  %2550 = vmatprep.mubr.f32.mxu1 %v1837_v36 }
 0x269   : > { %v1353_v1 = vpop.permute.xlu0 %1352  ;;  %v2525_v7 = vpop.f32.mrb[8].mxu0 }
 0x26a   : > { %1421 = vst.msk [vmem:[#allocation2 + $0xe0] sm:$0xff] %vm1392_vm6, %v1353_v1  ;;  %v777_v52 = vpop.permute.xlu1 %776  ;;  %v1972_v43 = vpop.f32.mrb[9].mxu0  ;;  %v1978_v53 = vadd.f32 %v2525_v7, %v3720_v49 }
 0x26b   : > { %843 = vst.msk [vmem:[#allocation2 + $0xf0] sm:$0xff] %vm812_vm3, %v777_v52  ;;  %v1973_v35 = vadd.f32 %v3720_v49, %v1972_v43 }
 0x26c   : > { %v2100_v10 = vmax.f32 %v1978_v53, 0.0 }
 0x26d   : > { %v2099_v26 = vmax.f32 %v1973_v35, 0.0  ;;  %v1355_v31 = vpop.permute.xlu0 %1354  ;;  %v1838_v25 = vld [vmem:[#allocation2 + $0xd8] sm:$0xff] }
 0x26e   : > { %1422 = vst.msk [vmem:[#allocation2 + $0xe8] sm:$0xff] %vm1392_vm6, %v1355_v31  ;;  %v1546_v54 = vpop.permute.xlu1 %1545  ;;  %2551 = vmatmul.mubr.f32.gmra.mrb[10].mxu1 %v1838_v25 }
 0x26f   : > { %v2130_v55 = vadd.f32 %v2129_v51, %v2099_v26  ;;  %1614 = vst.msk [vmem:[#allocation2 + $0xe0] sm:$0xff] %vm1585_vm7, %v1546_v54 }
 0x271   : > { %v779_v9 = vpop.permute.xlu0 %778  ;;  %v2131_v3 = vadd.f32 %v2130_v55, %v2100_v10 }
 0x272   : > { %844 = vst.msk [vmem:[#allocation2 + $0xf8] sm:$0xff] %vm812_vm3, %v779_v9  ;;  %v970_v45 = vpop.permute.xlu1 %969 }
 0x273   : > { %1036 = vst.msk [vmem:[#allocation2 + $0xf0] sm:$0xff] %vm1005_vm4, %v970_v45 }
 0x275   : > { %v1548_v18 = vpop.permute.xlu0 %1547 }
 0x276   : > { %1615 = vst.msk [vmem:[#allocation2 + $0xe8] sm:$0xff] %vm1585_vm7, %v1548_v18  ;;  %v1739_v28 = vpop.permute.xlu1 %1738 }
 0x277   : > { %1807 = vst.msk [vmem:[#allocation2 + $0xe0] sm:$0xff] %vm1778_vm8, %v1739_v28 }
 0x279   : > { %v972_v38 = vpop.permute.xlu0 %971 }
 0x27a   : > { %1037 = vst.msk [vmem:[#allocation2 + $0xf8] sm:$0xff] %vm1005_vm4, %v972_v38  ;;  %v1163_v44 = vpop.permute.xlu1 %1162 }
 0x27b   : > { %1229 = vst.msk [vmem:[#allocation2 + $0xf0] sm:$0xff] %vm1198_vm5, %v1163_v44 }
 0x27d   : > { %v1741_v56 = vpop.permute.xlu0 %1740 }
 0x27e   : > { %1808 = vst.msk [vmem:[#allocation2 + $0xe8] sm:$0xff] %vm1778_vm8, %v1741_v56  ;;  %v1165_v57 = vpop.permute.xlu1 %1164  ;;  %v1839_v12 = vld [vmem:[#allocation2 + $0xe0] sm:$0xff] }
 0x27f   : > { %1230 = vst.msk [vmem:[#allocation2 + $0xf8] sm:$0xff] %vm1198_vm5, %v1165_v57  ;;  %2553 = vmatprep.mubr.f32.mxu1 %v1839_v12 }
 0x281   : > { %v1357_v27 = vpop.permute.xlu0 %1356  ;;  %v2528_v37 = vpop.f32.mrb[10].mxu0 }
 0x282   : > { %1423 = vst.msk [vmem:[#allocation2 + $0xf0] sm:$0xff] %vm1392_vm6, %v1357_v27  ;;  %v1359_v58 = vpop.permute.xlu1 %1358  ;;  %v1982_v21 = vpop.f32.mrb[11].mxu0  ;;  %v1988_v11 = vadd.f32 %v2528_v37, %v3720_v49 }
 0x283   : > { %1424 = vst.msk [vmem:[#allocation2 + $0xf8] sm:$0xff] %vm1392_vm6, %v1359_v58  ;;  %v1983_v47 = vadd.f32 %v3720_v49, %v1982_v21 }
 0x284   : > { %v2102_v60 = vmax.f32 %v1988_v11, 0.0 }
 0x285   : > { %v2101_v46 = vmax.f32 %v1983_v47, 0.0  ;;  %v1550_v14 = vpop.permute.xlu0 %1549  ;;  %v1840_v32 = vld [vmem:[#allocation2 + $0xe8] sm:$0xff] }
 0x286   : > { %1616 = vst.msk [vmem:[#allocation2 + $0xf0] sm:$0xff] %vm1585_vm7, %v1550_v14  ;;  %v1552_v59 = vpop.permute.xlu1 %1551  ;;  %2554 = vmatmul.mubr.f32.gmra.mrb[12].mxu1 %v1840_v32 }
 0x287   : > { %v2132_v61 = vadd.f32 %v2131_v3, %v2101_v46  ;;  %1617 = vst.msk [vmem:[#allocation2 + $0xf8] sm:$0xff] %vm1585_vm7, %v1552_v59 }
 0x289   : > { %v1743_v16 = vpop.permute.xlu0 %1742  ;;  %v2133_v40 = vadd.f32 %v2132_v61, %v2102_v60 }
 0x28a   : > { %1809 = vst.msk [vmem:[#allocation2 + $0xf0] sm:$0xff] %vm1778_vm8, %v1743_v16  ;;  %v1745_v29 = vpop.permute.xlu1 %1744 }
 0x28b   : > { %1810 = vst.msk [vmem:[#allocation2 + $0xf8] sm:$0xff] %vm1778_vm8, %v1745_v29 }
 0x291   : > { %v1841_v20 = vld [vmem:[#allocation2 + $0xf0] sm:$0xff] }
 0x292   : > { %2556 = vmatprep.mubr.f32.mxu1 %v1841_v20  ;;  %v1842_v62 = vld [vmem:[#allocation2 + $0xf8] sm:$0xff] }
 0x293   : > { %2557 = vmatmul.mubr.f32.gmra.mrb[14].mxu1 %v1842_v62 }
 0x299   : > { %v2531_v15 = vpop.f32.mrb[12].mxu0 }
 0x29a   : > { %v1992_v48 = vpop.f32.mrb[13].mxu0  ;;  %v1998_v39 = vadd.f32 %v2531_v15, %v3720_v49 }
 0x29b   : > { %v1993_v63 = vadd.f32 %v3720_v49, %v1992_v48 }
 0x29c   : > { %v2104_v34 = vmax.f32 %v1998_v39, 0.0 }
 0x29d   : > { %v2103_v0 = vmax.f32 %v1993_v63, 0.0 }
 0x29f   : > { %v2134_v6 = vadd.f32 %v2133_v40, %v2103_v0 }
 0x2a1   : > { %v2135_v2 = vadd.f32 %v2134_v6, %v2104_v34 }
 0x2b1   : > { %v2534_v22 = vpop.f32.mrb[14].mxu0 }
 0x2b2   : > { %v2002_v5 = vpop.f32.mrb[15].mxu0  ;;  %v2008_v33 = vadd.f32 %v2534_v22, %v3720_v49 }
 0x2b3   : > { %v2003_v13 = vadd.f32 %v3720_v49, %v2002_v5 }
 0x2b4   : > { %v2106_v42 = vmax.f32 %v2008_v33, 0.0 }
 0x2b5   : > { %v2105_v30 = vmax.f32 %v2003_v13, 0.0 }
 0x2b7   : > { %v2136_v17 = vadd.f32 %v2135_v2, %v2105_v30 }
 0x2b9   : > { %v2137_v51 = vadd.f32 %v2136_v17, %v2106_v42 }
 0x2c9   : > { %v2537_v24 = vpop.f32.mrb[0].mxu1 }
 0x2ca   : > { %v2012_v19 = vpop.f32.mrb[1].mxu1  ;;  %v2018_v23 = vadd.f32 %v2537_v24, %v3720_v49 }
 0x2cb   : > { %v2013_v50 = vadd.f32 %v3720_v49, %v2012_v19 }
 0x2cc   : > { %v2108_v4 = vmax.f32 %v2018_v23, 0.0 }
 0x2cd   : > { %v2107_v41 = vmax.f32 %v2013_v50, 0.0 }
 0x2cf   : > { %v2138_v8 = vadd.f32 %v2137_v51, %v2107_v41 }
 0x2d1   : > { %v2139_v36 = vadd.f32 %v2138_v8, %v2108_v4 }
 0x2e1   : > { %v2540_v1 = vpop.f32.mrb[2].mxu1 }
 0x2e2   : > { %v2022_v7 = vpop.f32.mrb[3].mxu1  ;;  %v2028_v52 = vadd.f32 %v2540_v1, %v3720_v49 }
 0x2e3   : > { %v2023_v43 = vadd.f32 %v3720_v49, %v2022_v7 }
 0x2e4   : > { %v2110_v35 = vmax.f32 %v2028_v52, 0.0 }
 0x2e5   : > { %v2109_v53 = vmax.f32 %v2023_v43, 0.0 }
 0x2e7   : > { %v2140_v26 = vadd.f32 %v2139_v36, %v2109_v53 }
 0x2e9   : > { %v2141_v31 = vadd.f32 %v2140_v26, %v2110_v35 }
 0x2f9   : > { %v2543_v25 = vpop.f32.mrb[4].mxu1 }
 0x2fa   : > { %v2032_v54 = vpop.f32.mrb[5].mxu1  ;;  %v2038_v10 = vadd.f32 %v2543_v25, %v3720_v49 }
 0x2fb   : > { %v2033_v55 = vadd.f32 %v3720_v49, %v2032_v54 }
 0x2fc   : > { %v2112_v3 = vmax.f32 %v2038_v10, 0.0 }
 0x2fd   : > { %v2111_v9 = vmax.f32 %v2033_v55, 0.0 }
 0x2ff   : > { %v2142_v45 = vadd.f32 %v2141_v31, %v2111_v9 }
 0x301   : > { %v2143_v18 = vadd.f32 %v2142_v45, %v2112_v3 }
 0x311   : > { %v2546_v28 = vpop.f32.mrb[6].mxu1 }
 0x312   : > { %v2042_v38 = vpop.f32.mrb[7].mxu1  ;;  %v2048_v44 = vadd.f32 %v2546_v28, %v3720_v49 }
 0x313   : > { %v2043_v56 = vadd.f32 %v3720_v49, %v2042_v38 }
 0x314   : > { %v2114_v12 = vmax.f32 %v2048_v44, 0.0 }
 0x315   : > { %v2113_v57 = vmax.f32 %v2043_v56, 0.0 }
 0x317   : > { %v2144_v27 = vadd.f32 %v2143_v18, %v2113_v57 }
 0x319   : > { %v2145_v37 = vadd.f32 %v2144_v27, %v2114_v12 }
 0x329   : > { %v2549_v58 = vpop.f32.mrb[8].mxu1 }
 0x32a   : > { %v2052_v21 = vpop.f32.mrb[9].mxu1  ;;  %v2058_v11 = vadd.f32 %v2549_v58, %v3720_v49 }
 0x32b   : > { %v2053_v47 = vadd.f32 %v3720_v49, %v2052_v21 }
 0x32c   : > { %v2116_v14 = vmax.f32 %v2058_v11, 0.0 }
 0x32d   : > { %v2115_v46 = vmax.f32 %v2053_v47, 0.0 }
 0x32f   : > { %v2146_v32 = vadd.f32 %v2145_v37, %v2115_v46 }
 0x331   : > { %v2147_v59 = vadd.f32 %v2146_v32, %v2116_v14 }
 0x341   : > { %v2552_v60 = vpop.f32.mrb[10].mxu1 }
 0x342   : > { %v2062_v61 = vpop.f32.mrb[11].mxu1  ;;  %v2068_v16 = vadd.f32 %v2552_v60, %v3720_v49 }
 0x343   : > { %v2063_v40 = vadd.f32 %v3720_v49, %v2062_v61 }
 0x344   : > { %v2118_v20 = vmax.f32 %v2068_v16, 0.0 }
 0x345   : > { %v2117_v29 = vmax.f32 %v2063_v40, 0.0 }
 0x347   : > { %v2148_v62 = vadd.f32 %v2147_v59, %v2117_v29 }
 0x349   : > { %v2149_v15 = vadd.f32 %v2148_v62, %v2118_v20 }
 0x359   : > { %v2555_v48 = vpop.f32.mrb[12].mxu1 }
 0x35a   : > { %v2072_v39 = vpop.f32.mrb[13].mxu1  ;;  %v2078_v63 = vadd.f32 %v2555_v48, %v3720_v49 }
 0x35b   : > { %v2073_v0 = vadd.f32 %v3720_v49, %v2072_v39 }
 0x35c   : > { %v2120_v6 = vmax.f32 %v2078_v63, 0.0 }
 0x35d   : > { %v2119_v34 = vmax.f32 %v2073_v0, 0.0 }
 0x35f   : > { %v2150_v2 = vadd.f32 %v2149_v15, %v2119_v34 }
 0x361   : > { %v2151_v22 = vadd.f32 %v2150_v2, %v2120_v6 }
 0x366   : > { %v2558_v5 = vpop.f32.mrb[14].mxu1 }
 0x367   : > { %v2082_v33 = vpop.f32.mrb[15].mxu1  ;;  %v2088_v13 = vadd.f32 %v2558_v5, %v3720_v49 }
 0x368   : > { %v2083_v30 = vadd.f32 %v3720_v49, %v2082_v33 }
 0x369   : > { %v2122_v17 = vmax.f32 %v2088_v13, 0.0 }
 0x36a   : > { %v2121_v42 = vmax.f32 %v2083_v30, 0.0 }
 0x36c   : > { %v2152_v51 = vadd.f32 %v2151_v22, %v2121_v42 }
 0x36e   : > { %v2153_v24 = vadd.f32 %v2152_v51, %v2122_v17 }
 0x370   : > { %v2154_v19 = vrot.slane %v2153_v24, 4 }
 0x372   : > { %v2155_v23 = vadd.f32 %v2154_v19, %v2153_v24 }
 0x374   : > { %v2156_v50 = vrot.slane %v2155_v23, 2 }
 0x376   : > { %v2157_v41 = vadd.f32 %v2156_v50, %v2155_v23 }
 0x378   : > { %v2158_v4 = vrot.slane %v2157_v41, 1 }
 0x37a   : > { %v2159_v8 = vadd.f32 %v2158_v4, %v2157_v41 }
 0x37c   : > { %v2160_v36 = vmul.f32 0.00390625, %v2159_v8 }
 0x37e   : > { %2161 = vst [vmem:[%s162_s17] sm:$0x1] %v2160_v36 }
 0x37f   : > { %2669 = shalt.err (!%p2666_p3)
}
 0x380   : > { %s2670_s6 = scalar_lea.hbm %s3829_s25, 16  ;;  %s2674_s9 = scalar_lea.hbm %s3874_s3, 96 }
 0x381   : > { %p2671_p4 = scmp.ne.s32.totalorder %s3829_s25, %s2670_s6  ;;  %p2675_p9 = scmp.lt.u32.totalorder %s3829_s25, %s3874_s3 }
 0x382   : > { %p2676_p10 = scmp.lt.u32.totalorder %s2674_s9, %s2670_s6  ;;  %p2678_p12 = scmp.lt.u32.totalorder %s2670_s6, %s3829_s25 }
 0x383   : > { %p2672_p7 = pnand %p2671_p4, %p2788_p5 }
 0x384   : > { %p2677_p11 = por %p2676_p10, %p2675_p9 }
 0x385   : > { %p2673_p8 = pneg %p2672_p7 }
 0x386   : > { %p2679_p13 = por %p2678_p12, %p2677_p11 }
 0x388   : > { %p2680_p0 = pnand %p2679_p13, %p2673_p8 }
 0x38a   : > { %2683 = shalt.err (!%p2680_p0)
}
 0x38b   : > { %2608 = dma.vmem_to_hbm [thread:$0]  (%p2788_p5), %s3831_s19, 16, %s3829_s25, %s2163_s26  }
 0x38c PF: > { %p2614_p1 = scmp.ge.s32.totalorder %s2718_s15, 2  ;;  %s2187_s5 = sand.u32 1, %s2706_s12  }
 0x38d   : > { %s2188_s28 = scalar_lea.sflag [#allocation4], %s2187_s5 }
 0x38e   : > { %p2611_p2 = pnand %p2614_p1, %p2792_p6 }
 0x390   : > { %2701 = dma.done.wait (!%p2611_p2), %s2188_s28, 16  }
 0x391   : > { %2703 = vsyncadd (!%p2611_p2), %s2188_s28, 4294967280  ;;  %p13_p3 = scmp.ge.s32.totalorder %s2775_s18, 8   ;;  %s3877_s12 = smov %s2710_s13 }
 0x392   : > { %s3878_s13 = smov %s2714_s14  ;;  %s3879_s14 = smov %s2786_s21 }
 0x393   : > { %s3880_s15 = smov %s2775_s18  ;;  %15 = sbr.rel (!%p13_p3) target bundleno = 3 (0x3), region = 69 }
 0x39a   :  { %2192 = vsyncpa [#allocation4], 1 }
 0x39b   :  { %2194 = vsyncpa [#allocation4 + $0x1], 1 }

</bundles_post_ra>
